<compile_context>
chip_gen: v7x
topology: tpu7x:2x2x1
jax: 0.10.0
libtpu: 0.0.40
codegen_flags: <defaults>
</compile_context>

<pallas_src>
import functools
import math

import jax
import jax.numpy as jnp
from jax.experimental import pallas as pl
from jax.experimental.pallas import tpu as pltpu


# --------------------------------------------------------------------------- kernel

def cross_attn_kernel(t_ref, s_ref, wq_ref, wk_ref, wv_ref, wo_ref, g_ref, b_ref,
                      o_ref, *, num_heads, head_dim, e_true, eps):
    # t_ref : (Bblk, Nq, Ep)   padded target / query tokens (compute dtype)
    # s_ref : (Bblk, Nk, Dkp)  padded source tokens (keys & values)
    # wq_ref: (Ep, E) scale folded in; wk_ref/wv_ref: (Dkp, E); wo_ref: (E, Ep)
    # g_ref, b_ref: (1, Ep) zero-padded LayerNorm gamma / beta (f32)
    bblk, nq, ep = t_ref.shape
    _, nk, dkp = s_ref.shape
    rows_q = bblk * nq
    rows_k = bblk * nk
    dtype = t_ref.dtype                       # MXU operand dtype (bf16 fast path)
    e_heads = num_heads * head_dim            # true (unpadded) embed dim

    tgt2 = t_ref[...].reshape(rows_q, ep)     # flatten rows: big MXU M dimension
    src2 = s_ref[...].reshape(rows_k, dkp)

    # Q/K/V projections on the flattened row slab; f32 accumulation, operands in
    # the compute dtype so bf16 inputs stay on the fast MXU path.
    q = jnp.dot(tgt2, wq_ref[...], preferred_element_type=jnp.float32).astype(dtype)
    k = jnp.dot(src2, wk_ref[...], preferred_element_type=jnp.float32).astype(dtype)
    v = jnp.dot(src2, wv_ref[...], preferred_element_type=jnp.float32).astype(dtype)
    q3 = q.reshape(bblk, nq, e_heads)
    k3 = k.reshape(bblk, nk, e_heads)
    v3 = v.reshape(bblk, nk, e_heads)

    # Per-head attention with 3-D single-batch einsums (supported by Mosaic);
    # softmax is normalized AFTER the PV matmul (touches Nk/head_dim fewer elems).
    head_outs = []
    for h in range(num_heads):                # static unroll over heads
        lo = h * head_dim
        hi = lo + head_dim
        qh = q3[:, :, lo:hi]                  # (Bblk, Nq, D)
        kh = k3[:, :, lo:hi]                  # (Bblk, Nk, D)
        vh = v3[:, :, lo:hi]                  # (Bblk, Nk, D)

        scores = jnp.einsum("bqd,bkd->bqk", qh, kh,
                            preferred_element_type=jnp.float32)   # (Bblk, Nq, Nk)
        scores = scores - jnp.max(scores, axis=-1, keepdims=True)
        p = jnp.exp(scores)
        denom = jnp.sum(p, axis=-1, keepdims=True)                # (Bblk, Nq, 1)

        oh = jnp.einsum("bqk,bkd->bqd", p.astype(dtype), vh,
                        preferred_element_type=jnp.float32)        # (Bblk, Nq, D)
        oh = oh * pl.reciprocal(denom, approx=True)                # EUP reciprocal
        head_outs.append(oh.astype(dtype))

    # One lane concat of head outputs, then a SINGLE full-K Wo matmul.
    o = jnp.concatenate(head_outs, axis=-1).reshape(rows_q, e_heads)
    acc = jnp.dot(o, wo_ref[...], preferred_element_type=jnp.float32)  # (Rq, Ep)

    # Residual + LayerNorm (f32, one-pass statistics over the TRUE feature count;
    # padded lanes of both acc and tgt2 are exactly zero).
    z = acc + tgt2.astype(jnp.float32)
    inv_e = jnp.float32(1.0 / e_true)
    s1 = jnp.sum(z, axis=-1, keepdims=True)
    s2 = jnp.sum(z * z, axis=-1, keepdims=True)
    mean = s1 * inv_e
    var = s2 * inv_e - mean * mean
    zn = (z - mean) * jax.lax.rsqrt(var + eps)
    y = zn * g_ref[...] + b_ref[...]          # padded lanes -> exactly 0

    o_ref[...] = y.reshape(bblk, nq, ep).astype(o_ref.dtype)


# --------------------------------------------------------------------------- helpers

def _round_up(x, m):
    return (x + m - 1) // m * m


def _tpu_memory_profile():
    """Return (vmem_limit_bytes, multi_core) chosen from the local chip generation."""
    mib = 1024 * 1024
    try:
        cap = int(pltpu.get_tpu_info().vmem_capacity_bytes)
    except Exception:            # no query available: assume most constrained chip
        cap = 64 * mib
    multi_core = cap <= 64 * mib          # v7x: 64 MiB VMEM, 2 TensorCores / chip
    limit = max(32 * mib, min(cap - 24 * mib, 96 * mib))
    return limit, multi_core


def _pick_batch_block(batch, nq, nk, ep, dkp, itemsize, *, multi_core,
                      vmem_limit_bytes):
    """Largest batch-block divisor of `batch` that keeps the pipelined activation
    blocks comfortably inside VMEM.  On 2-TensorCore chips (v7x) keep >= 2 grid
    steps so both cores get work; otherwise grow the block (single-TC chips gain
    nothing from extra grid steps)."""
    # rough per-batch-element bytes of the pipelined blocks (target in+out and
    # source, double-buffered)
    per_b = (2 * 2 * nq * ep + 2 * nk * dkp) * itemsize
    row_cap = 512 if multi_core else 2048
    budget = vmem_limit_bytes // 3        # leave room for weights + intermediates

    divisors = [d for d in range(1, batch + 1) if batch % d == 0]
    cands = [d for d in divisors if d * nq <= row_cap and d * per_b <= budget] or [1]
    if multi_core:
        multi = [d for d in cands if batch // d >= 2]
        if multi:
            cands = multi
    pref = [d for d in cands if (d * nq) % 256 == 0] or cands   # full MXU passes
    return max(pref)


def prepare_params(params, *, num_heads, compute_dtype=jnp.float32, lane=128):
    """One-time conversion of PyTorch-layout params into kernel-ready form."""
    E = params["wq"].shape[0]
    Dk = params["wk"].shape[1]
    Dv = params["wv"].shape[1]
    assert Dk == Dv, "CrossAttentionBlock feeds source to both to_k and to_v"
    assert E % num_heads == 0
    head_dim = E // num_heads
    Ep, Dkp = _round_up(E, lane), _round_up(Dk, lane)
    scale = 1.0 / math.sqrt(head_dim)

    pad_rows = lambda w, r: jnp.pad(w, ((0, r - w.shape[0]), (0, 0)))
    pad_cols = lambda w, c: jnp.pad(w, ((0, 0), (0, c - w.shape[1])))

    return {
        "wq_t": pad_rows(params["wq"].T * scale, Ep).astype(compute_dtype),  # (Ep, E)
        "wk_t": pad_rows(params["wk"].T, Dkp).astype(compute_dtype),         # (Dkp, E)
        "wv_t": pad_rows(params["wv"].T, Dkp).astype(compute_dtype),         # (Dkp, E)
        "wo_t": pad_cols(params["wo"].T, Ep).astype(compute_dtype),          # (E, Ep)
        "gamma": pad_cols(params["gamma"].reshape(1, E), Ep).astype(jnp.float32),
        "beta": pad_cols(params["beta"].reshape(1, E), Ep).astype(jnp.float32),
        "embed_dim": E, "k_dim": Dk, "embed_dim_p": Ep, "k_dim_p": Dkp,
        "num_heads": num_heads, "head_dim": head_dim,
        "compute_dtype": compute_dtype,
    }


# --------------------------------------------------------------------------- wrapper

def cross_attention_block(source, target, prepared, *, eps=1e-5):
    """source: (B, Nk, Dk), target: (B, Nq, E)  ->  (B, Nq, E)."""
    B, Nq, E = target.shape
    Bs, Nk, Dk = source.shape
    assert Bs == B and E == prepared["embed_dim"] and Dk == prepared["k_dim"]
    Ep, Dkp = prepared["embed_dim_p"], prepared["k_dim_p"]
    H, D = prepared["num_heads"], prepared["head_dim"]
    cdt = prepared["compute_dtype"]

    tgt = target.astype(cdt)
    src = source.astype(cdt)
    if Ep != E:
        tgt = jnp.pad(tgt, ((0, 0), (0, 0), (0, Ep - E)))      # lane-dense loads/stores
    if Dkp != Dk:
        src = jnp.pad(src, ((0, 0), (0, 0), (0, Dkp - Dk)))

    vmem_limit, multi_core = _tpu_memory_profile()
    bblk = _pick_batch_block(B, Nq, Nk, Ep, Dkp, jnp.dtype(cdt).itemsize,
                             multi_core=multi_core, vmem_limit_bytes=vmem_limit)
    grid = (B // bblk,)

    kernel = functools.partial(cross_attn_kernel, num_heads=H, head_dim=D,
                               e_true=E, eps=eps)

    def run(single_buffer_weights):
        def const_spec(shape):
            idx = lambda b: (0,) * len(shape)
            if single_buffer_weights:
                # grid-invariant weights: one VMEM buffer is enough
                return pl.BlockSpec(shape, idx, pipeline_mode=pl.Buffered(1))
            return pl.BlockSpec(shape, idx)

        return pl.pallas_call(
            kernel,
            out_shape=jax.ShapeDtypeStruct((B, Nq, Ep), tgt.dtype),
            grid_spec=pltpu.PrefetchScalarGridSpec(
                num_scalar_prefetch=0,
                grid=grid,
                in_specs=[
                    pl.BlockSpec((bblk, Nq, Ep), lambda b: (b, 0, 0)),    # target
                    pl.BlockSpec((bblk, Nk, Dkp), lambda b: (b, 0, 0)),   # source
                    const_spec((Ep, E)),       # Wq^T (scaled)
                    const_spec((Dkp, E)),      # Wk^T
                    const_spec((Dkp, E)),      # Wv^T
                    const_spec((E, Ep)),       # Wo^T
                    const_spec((1, Ep)),       # gamma
                    const_spec((1, Ep)),       # beta
                ],
                out_specs=pl.BlockSpec((bblk, Nq, Ep), lambda b: (b, 0, 0)),
            ),
            compiler_params=pltpu.CompilerParams(
                dimension_semantics=("parallel",),
                vmem_limit_bytes=vmem_limit,
            ),
        )(tgt, src, prepared["wq_t"], prepared["wk_t"], prepared["wv_t"],
          prepared["wo_t"], prepared["gamma"], prepared["beta"])

    try:
        out = run(True)
    except Exception:
        # pipeline_mode=pl.Buffered(1) not supported by this jax build: fall back
        # to default (double-buffered) weight specs.
        out = run(False)
    return out[:, :, :E] if Ep != E else out


# --------------------------------------------------------------------------- reference

def init_params(key, embed_dim, k_dim, v_dim):
    ks = jax.random.split(key, 4)
    scale = 0.02
    return {
        # PyTorch nn.Linear weight layout: (out_features, in_features)
        "wq": scale * jax.random.normal(ks[0], (embed_dim, embed_dim), jnp.float32),
        "wk": scale * jax.random.normal(ks[1], (embed_dim, k_dim), jnp.float32),
        "wv": scale * jax.random.normal(ks[2], (embed_dim, v_dim), jnp.float32),
        "wo": scale * jax.random.normal(ks[3], (embed_dim, embed_dim), jnp.float32),
        # nn.LayerNorm default init: weight=1, bias=0
        "gamma": jnp.ones((embed_dim,), jnp.float32),
        "beta": jnp.zeros((embed_dim,), jnp.float32),
    }


def reference(source, target, params, *, num_heads):
    """Pure-JAX reference matching the PyTorch forward."""
    B, Nq, E = target.shape
    D = E // num_heads
    q = target @ params["wq"].T
    k = source @ params["wk"].T
    v = source @ params["wv"].T

    def split(x):  # b n (h d) -> b h n d
        b, n, _ = x.shape
        return x.reshape(b, n, num_heads, D).transpose(0, 2, 1, 3)

    q, k, v = split(q), split(k), split(v)
    s = jnp.einsum("bhnd,bhmd->bhnm", q, k) / jnp.sqrt(jnp.float32(D))
    p = jax.nn.softmax(s, axis=-1)
    o = jnp.einsum("bhnm,bhmd->bhnd", p, v)
    o = o.transpose(0, 2, 1, 3).reshape(B, Nq, E)
    o = o @ params["wo"].T
    z = o + target
    mean = jnp.mean(z, axis=-1, keepdims=True)
    var = jnp.mean((z - mean) ** 2, axis=-1, keepdims=True)
    zn = (z - mean) / jnp.sqrt(var + 1e-5)
    return zn * params["gamma"] + params["beta"]


if __name__ == "__main__":
    B, Nq, Nk = 2, 8, 8
    embed_dim, num_heads = 32, 4
    k_dim = v_dim = 16

    key = jax.random.PRNGKey(0)
    k_src, k_tgt, k_par = jax.random.split(key, 3)
    source = jax.random.normal(k_src, (B, Nk, k_dim), jnp.float32)
    target = jax.random.normal(k_tgt, (B, Nq, embed_dim), jnp.float32)
    params = init_params(k_par, embed_dim, k_dim, v_dim)

    # One-time weight preparation (transpose, scale-fold, lane padding, dtype cast).
    prepared = prepare_params(params, num_heads=num_heads, compute_dtype=jnp.float32)

    out = cross_attention_block(source, target, prepared)
    out = jax.block_until_ready(out)

    ref = reference(source, target, params, num_heads=num_heads)
    assert out.shape == (B, Nq, embed_dim)
    # Tolerance covers the EUP approximate-reciprocal softmax and the one-pass
    # LayerNorm variance; both are far below any structural error.
    assert jnp.allclose(out, ref, atol=2e-3, rtol=2e-3), (
        float(jnp.max(jnp.abs(out - ref))))

    print("KERNEL_OK")
</pallas_src>

<mosaic_0001>
module attributes {stable_mosaic.version = 11 : i64} {
  func.func @cross_attn_kernel(%arg0: i32, %arg1: memref<1x8x128xf32, #tpu.memory_space<vmem>>, %arg2: memref<1x8x128xf32, #tpu.memory_space<vmem>>, %arg3: memref<128x32xf32, #tpu.memory_space<vmem>>, %arg4: memref<128x32xf32, #tpu.memory_space<vmem>>, %arg5: memref<128x32xf32, #tpu.memory_space<vmem>>, %arg6: memref<32x128xf32, #tpu.memory_space<vmem>>, %arg7: memref<1x128xf32, #tpu.memory_space<vmem>>, %arg8: memref<1x128xf32, #tpu.memory_space<vmem>>, %arg9: memref<1x8x128xf32, #tpu.memory_space<vmem>>) attributes {dimension_semantics = [#tpu.dimension_semantics<parallel>], iteration_bounds = array<i64: 2>, scalar_prefetch = 0 : i64, scratch_operands = 0 : i64, tpu.core_type = #tpu.core_type<tc>, window_params = [{transform_indices = @transform_0, window_bounds = array<i64: 1, 8, 128>}, {transform_indices = @transform_1, window_bounds = array<i64: 1, 8, 128>}, {pipeline_mode = #tpu.pipeline_mode<synchronous>, transform_indices = @transform_2, window_bounds = array<i64: 128, 32>}, {pipeline_mode = #tpu.pipeline_mode<synchronous>, transform_indices = @transform_3, window_bounds = array<i64: 128, 32>}, {pipeline_mode = #tpu.pipeline_mode<synchronous>, transform_indices = @transform_4, window_bounds = array<i64: 128, 32>}, {pipeline_mode = #tpu.pipeline_mode<synchronous>, transform_indices = @transform_5, window_bounds = array<i64: 32, 128>}, {pipeline_mode = #tpu.pipeline_mode<synchronous>, transform_indices = @transform_6, window_bounds = array<i64: 1, 128>}, {pipeline_mode = #tpu.pipeline_mode<synchronous>, transform_indices = @transform_7, window_bounds = array<i64: 1, 128>}, {transform_indices = @transform_8, window_bounds = array<i64: 1, 8, 128>}]} {
    %c0 = arith.constant 0 : index
    %c0_0 = arith.constant 0 : index
    %c0_1 = arith.constant 0 : index
    %0 = vector.load %arg1[%c0, %c0_0, %c0_1] : memref<1x8x128xf32, #tpu.memory_space<vmem>>, vector<1x8x128xf32>
    %1 = vector.shape_cast %0 : vector<1x8x128xf32> to vector<8x128xf32>
    %c0_2 = arith.constant 0 : index
    %c0_3 = arith.constant 0 : index
    %c0_4 = arith.constant 0 : index
    %2 = vector.load %arg2[%c0_2, %c0_3, %c0_4] : memref<1x8x128xf32, #tpu.memory_space<vmem>>, vector<1x8x128xf32>
    %3 = vector.shape_cast %2 : vector<1x8x128xf32> to vector<8x128xf32>
    %c0_5 = arith.constant 0 : index
    %c0_6 = arith.constant 0 : index
    %4 = vector.load %arg3[%c0_5, %c0_6] : memref<128x32xf32, #tpu.memory_space<vmem>>, vector<128x32xf32>
    %cst = arith.constant dense<0.000000e+00> : vector<8x32xf32>
    %5 = tpu.matmul %1, %4, %cst {dimension_numbers = #tpu.dot_dimension_numbers<[1], [0], [0], [1], [0, 0, 1, 1], [], []>} : vector<8x128xf32>, vector<128x32xf32>, vector<8x32xf32> -> vector<8x32xf32>
    %c0_7 = arith.constant 0 : index
    %c0_8 = arith.constant 0 : index
    %6 = vector.load %arg4[%c0_7, %c0_8] : memref<128x32xf32, #tpu.memory_space<vmem>>, vector<128x32xf32>
    %cst_9 = arith.constant dense<0.000000e+00> : vector<8x32xf32>
    %7 = tpu.matmul %3, %6, %cst_9 {dimension_numbers = #tpu.dot_dimension_numbers<[1], [0], [0], [1], [0, 0, 1, 1], [], []>} : vector<8x128xf32>, vector<128x32xf32>, vector<8x32xf32> -> vector<8x32xf32>
    %c0_10 = arith.constant 0 : index
    %c0_11 = arith.constant 0 : index
    %8 = vector.load %arg5[%c0_10, %c0_11] : memref<128x32xf32, #tpu.memory_space<vmem>>, vector<128x32xf32>
    %cst_12 = arith.constant dense<0.000000e+00> : vector<8x32xf32>
    %9 = tpu.matmul %3, %8, %cst_12 {dimension_numbers = #tpu.dot_dimension_numbers<[1], [0], [0], [1], [0, 0, 1, 1], [], []>} : vector<8x128xf32>, vector<128x32xf32>, vector<8x32xf32> -> vector<8x32xf32>
    %10 = vector.shape_cast %5 : vector<8x32xf32> to vector<1x8x32xf32>
    %11 = vector.shape_cast %7 : vector<8x32xf32> to vector<1x8x32xf32>
    %12 = vector.shape_cast %9 : vector<8x32xf32> to vector<1x8x32xf32>
    %13 = vector.extract_strided_slice %10 {offsets = [0, 0, 0], sizes = [1, 8, 8], strides = [1, 1, 1]} : vector<1x8x32xf32> to vector<1x8x8xf32>
    %14 = vector.extract_strided_slice %11 {offsets = [0, 0, 0], sizes = [1, 8, 8], strides = [1, 1, 1]} : vector<1x8x32xf32> to vector<1x8x8xf32>
    %15 = vector.extract_strided_slice %12 {offsets = [0, 0, 0], sizes = [1, 8, 8], strides = [1, 1, 1]} : vector<1x8x32xf32> to vector<1x8x8xf32>
    "tpu.trace_start"() <{level = 10 : i32, message = "bqd,bkd->bqk"}> : () -> ()
    %cst_13 = arith.constant dense<0.000000e+00> : vector<1x8x8xf32>
    %16 = tpu.matmul %13, %14, %cst_13 {dimension_numbers = #tpu.dot_dimension_numbers<[2], [2], [1], [1], [0, 0, 0, 1, 1, 1], [0], [0]>} : vector<1x8x8xf32>, vector<1x8x8xf32>, vector<1x8x8xf32> -> vector<1x8x8xf32>
    "tpu.trace_stop"() : () -> ()
    %cst_14 = arith.constant dense<0xFF800000> : vector<1x8xf32>
    %17 = vector.multi_reduction <maximumf>, %16, %cst_14 [2] : vector<1x8x8xf32> to vector<1x8xf32>
    %18 = vector.shape_cast %17 : vector<1x8xf32> to vector<1x8x1xf32>
    %19 = vector.broadcast %18 : vector<1x8x1xf32> to vector<1x8x8xf32>
    %20 = arith.subf %16, %19 : vector<1x8x8xf32>
    %21 = math.exp %20 : vector<1x8x8xf32>
    %cst_15 = arith.constant dense<0.000000e+00> : vector<1x8xf32>
    %22 = vector.multi_reduction <add>, %21, %cst_15 [2] : vector<1x8x8xf32> to vector<1x8xf32>
    %23 = vector.shape_cast %22 : vector<1x8xf32> to vector<1x8x1xf32>
    "tpu.trace_start"() <{level = 10 : i32, message = "bqk,bkd->bqd"}> : () -> ()
    %cst_16 = arith.constant dense<0.000000e+00> : vector<1x8x8xf32>
    %24 = tpu.matmul %21, %15, %cst_16 {dimension_numbers = #tpu.dot_dimension_numbers<[2], [1], [1], [2], [0, 0, 0, 1, 1, 2], [0], [0]>} : vector<1x8x8xf32>, vector<1x8x8xf32>, vector<1x8x8xf32> -> vector<1x8x8xf32>
    "tpu.trace_stop"() : () -> ()
    %25 = tpu.reciprocal %23 {approx = true} : vector<1x8x1xf32> -> vector<1x8x1xf32>
    %26 = vector.broadcast %25 : vector<1x8x1xf32> to vector<1x8x8xf32>
    %27 = arith.mulf %24, %26 : vector<1x8x8xf32>
    %28 = vector.extract_strided_slice %10 {offsets = [0, 0, 8], sizes = [1, 8, 8], strides = [1, 1, 1]} : vector<1x8x32xf32> to vector<1x8x8xf32>
    %29 = vector.extract_strided_slice %11 {offsets = [0, 0, 8], sizes = [1, 8, 8], strides = [1, 1, 1]} : vector<1x8x32xf32> to vector<1x8x8xf32>
    %30 = vector.extract_strided_slice %12 {offsets = [0, 0, 8], sizes = [1, 8, 8], strides = [1, 1, 1]} : vector<1x8x32xf32> to vector<1x8x8xf32>
    "tpu.trace_start"() <{level = 10 : i32, message = "bqd,bkd->bqk"}> : () -> ()
    %cst_17 = arith.constant dense<0.000000e+00> : vector<1x8x8xf32>
    %31 = tpu.matmul %28, %29, %cst_17 {dimension_numbers = #tpu.dot_dimension_numbers<[2], [2], [1], [1], [0, 0, 0, 1, 1, 1], [0], [0]>} : vector<1x8x8xf32>, vector<1x8x8xf32>, vector<1x8x8xf32> -> vector<1x8x8xf32>
    "tpu.trace_stop"() : () -> ()
    %cst_18 = arith.constant dense<0xFF800000> : vector<1x8xf32>
    %32 = vector.multi_reduction <maximumf>, %31, %cst_18 [2] : vector<1x8x8xf32> to vector<1x8xf32>
    %33 = vector.shape_cast %32 : vector<1x8xf32> to vector<1x8x1xf32>
    %34 = vector.broadcast %33 : vector<1x8x1xf32> to vector<1x8x8xf32>
    %35 = arith.subf %31, %34 : vector<1x8x8xf32>
    %36 = math.exp %35 : vector<1x8x8xf32>
    %cst_19 = arith.constant dense<0.000000e+00> : vector<1x8xf32>
    %37 = vector.multi_reduction <add>, %36, %cst_19 [2] : vector<1x8x8xf32> to vector<1x8xf32>
    %38 = vector.shape_cast %37 : vector<1x8xf32> to vector<1x8x1xf32>
    "tpu.trace_start"() <{level = 10 : i32, message = "bqk,bkd->bqd"}> : () -> ()
    %cst_20 = arith.constant dense<0.000000e+00> : vector<1x8x8xf32>
    %39 = tpu.matmul %36, %30, %cst_20 {dimension_numbers = #tpu.dot_dimension_numbers<[2], [1], [1], [2], [0, 0, 0, 1, 1, 2], [0], [0]>} : vector<1x8x8xf32>, vector<1x8x8xf32>, vector<1x8x8xf32> -> vector<1x8x8xf32>
    "tpu.trace_stop"() : () -> ()
    %40 = tpu.reciprocal %38 {approx = true} : vector<1x8x1xf32> -> vector<1x8x1xf32>
    %41 = vector.broadcast %40 : vector<1x8x1xf32> to vector<1x8x8xf32>
    %42 = arith.mulf %39, %41 : vector<1x8x8xf32>
    %43 = vector.extract_strided_slice %10 {offsets = [0, 0, 16], sizes = [1, 8, 8], strides = [1, 1, 1]} : vector<1x8x32xf32> to vector<1x8x8xf32>
    %44 = vector.extract_strided_slice %11 {offsets = [0, 0, 16], sizes = [1, 8, 8], strides = [1, 1, 1]} : vector<1x8x32xf32> to vector<1x8x8xf32>
    %45 = vector.extract_strided_slice %12 {offsets = [0, 0, 16], sizes = [1, 8, 8], strides = [1, 1, 1]} : vector<1x8x32xf32> to vector<1x8x8xf32>
    "tpu.trace_start"() <{level = 10 : i32, message = "bqd,bkd->bqk"}> : () -> ()
    %cst_21 = arith.constant dense<0.000000e+00> : vector<1x8x8xf32>
    %46 = tpu.matmul %43, %44, %cst_21 {dimension_numbers = #tpu.dot_dimension_numbers<[2], [2], [1], [1], [0, 0, 0, 1, 1, 1], [0], [0]>} : vector<1x8x8xf32>, vector<1x8x8xf32>, vector<1x8x8xf32> -> vector<1x8x8xf32>
    "tpu.trace_stop"() : () -> ()
    %cst_22 = arith.constant dense<0xFF800000> : vector<1x8xf32>
    %47 = vector.multi_reduction <maximumf>, %46, %cst_22 [2] : vector<1x8x8xf32> to vector<1x8xf32>
    %48 = vector.shape_cast %47 : vector<1x8xf32> to vector<1x8x1xf32>
    %49 = vector.broadcast %48 : vector<1x8x1xf32> to vector<1x8x8xf32>
    %50 = arith.subf %46, %49 : vector<1x8x8xf32>
    %51 = math.exp %50 : vector<1x8x8xf32>
    %cst_23 = arith.constant dense<0.000000e+00> : vector<1x8xf32>
    %52 = vector.multi_reduction <add>, %51, %cst_23 [2] : vector<1x8x8xf32> to vector<1x8xf32>
    %53 = vector.shape_cast %52 : vector<1x8xf32> to vector<1x8x1xf32>
    "tpu.trace_start"() <{level = 10 : i32, message = "bqk,bkd->bqd"}> : () -> ()
    %cst_24 = arith.constant dense<0.000000e+00> : vector<1x8x8xf32>
    %54 = tpu.matmul %51, %45, %cst_24 {dimension_numbers = #tpu.dot_dimension_numbers<[2], [1], [1], [2], [0, 0, 0, 1, 1, 2], [0], [0]>} : vector<1x8x8xf32>, vector<1x8x8xf32>, vector<1x8x8xf32> -> vector<1x8x8xf32>
    "tpu.trace_stop"() : () -> ()
    %55 = tpu.reciprocal %53 {approx = true} : vector<1x8x1xf32> -> vector<1x8x1xf32>
    %56 = vector.broadcast %55 : vector<1x8x1xf32> to vector<1x8x8xf32>
    %57 = arith.mulf %54, %56 : vector<1x8x8xf32>
    %58 = vector.extract_strided_slice %10 {offsets = [0, 0, 24], sizes = [1, 8, 8], strides = [1, 1, 1]} : vector<1x8x32xf32> to vector<1x8x8xf32>
    %59 = vector.extract_strided_slice %11 {offsets = [0, 0, 24], sizes = [1, 8, 8], strides = [1, 1, 1]} : vector<1x8x32xf32> to vector<1x8x8xf32>
    %60 = vector.extract_strided_slice %12 {offsets = [0, 0, 24], sizes = [1, 8, 8], strides = [1, 1, 1]} : vector<1x8x32xf32> to vector<1x8x8xf32>
    "tpu.trace_start"() <{level = 10 : i32, message = "bqd,bkd->bqk"}> : () -> ()
    %cst_25 = arith.constant dense<0.000000e+00> : vector<1x8x8xf32>
    %61 = tpu.matmul %58, %59, %cst_25 {dimension_numbers = #tpu.dot_dimension_numbers<[2], [2], [1], [1], [0, 0, 0, 1, 1, 1], [0], [0]>} : vector<1x8x8xf32>, vector<1x8x8xf32>, vector<1x8x8xf32> -> vector<1x8x8xf32>
    "tpu.trace_stop"() : () -> ()
    %cst_26 = arith.constant dense<0xFF800000> : vector<1x8xf32>
    %62 = vector.multi_reduction <maximumf>, %61, %cst_26 [2] : vector<1x8x8xf32> to vector<1x8xf32>
    %63 = vector.shape_cast %62 : vector<1x8xf32> to vector<1x8x1xf32>
    %64 = vector.broadcast %63 : vector<1x8x1xf32> to vector<1x8x8xf32>
    %65 = arith.subf %61, %64 : vector<1x8x8xf32>
    %66 = math.exp %65 : vector<1x8x8xf32>
    %cst_27 = arith.constant dense<0.000000e+00> : vector<1x8xf32>
    %67 = vector.multi_reduction <add>, %66, %cst_27 [2] : vector<1x8x8xf32> to vector<1x8xf32>
    %68 = vector.shape_cast %67 : vector<1x8xf32> to vector<1x8x1xf32>
    "tpu.trace_start"() <{level = 10 : i32, message = "bqk,bkd->bqd"}> : () -> ()
    %cst_28 = arith.constant dense<0.000000e+00> : vector<1x8x8xf32>
    %69 = tpu.matmul %66, %60, %cst_28 {dimension_numbers = #tpu.dot_dimension_numbers<[2], [1], [1], [2], [0, 0, 0, 1, 1, 2], [0], [0]>} : vector<1x8x8xf32>, vector<1x8x8xf32>, vector<1x8x8xf32> -> vector<1x8x8xf32>
    "tpu.trace_stop"() : () -> ()
    %70 = tpu.reciprocal %68 {approx = true} : vector<1x8x1xf32> -> vector<1x8x1xf32>
    %71 = vector.broadcast %70 : vector<1x8x1xf32> to vector<1x8x8xf32>
    %72 = arith.mulf %69, %71 : vector<1x8x8xf32>
    %73 = tpu.concatenate %27, %42, %57, %72 in 2 : vector<1x8x8xf32>, vector<1x8x8xf32>, vector<1x8x8xf32>, vector<1x8x8xf32> -> vector<1x8x32xf32>
    %74 = vector.shape_cast %73 : vector<1x8x32xf32> to vector<8x32xf32>
    %c0_29 = arith.constant 0 : index
    %c0_30 = arith.constant 0 : index
    %75 = vector.load %arg6[%c0_29, %c0_30] : memref<32x128xf32, #tpu.memory_space<vmem>>, vector<32x128xf32>
    %cst_31 = arith.constant dense<0.000000e+00> : vector<8x128xf32>
    %76 = tpu.matmul %74, %75, %cst_31 {dimension_numbers = #tpu.dot_dimension_numbers<[1], [0], [0], [1], [0, 0, 1, 1], [], []>} : vector<8x32xf32>, vector<32x128xf32>, vector<8x128xf32> -> vector<8x128xf32>
    %77 = arith.addf %76, %1 : vector<8x128xf32>
    %cst_32 = arith.constant dense<0.000000e+00> : vector<8xf32>
    %78 = vector.multi_reduction <add>, %77, %cst_32 [1] : vector<8x128xf32> to vector<8xf32>
    %79 = vector.shape_cast %78 : vector<8xf32> to vector<8x1xf32>
    %80 = arith.mulf %77, %77 : vector<8x128xf32>
    %cst_33 = arith.constant dense<0.000000e+00> : vector<8xf32>
    %81 = vector.multi_reduction <add>, %80, %cst_33 [1] : vector<8x128xf32> to vector<8xf32>
    %82 = vector.shape_cast %81 : vector<8xf32> to vector<8x1xf32>
    %cst_34 = arith.constant 3.125000e-02 : f32
    %83 = vector.broadcast %cst_34 : f32 to vector<8x1xf32>
    %84 = arith.mulf %79, %83 : vector<8x1xf32>
    %cst_35 = arith.constant 3.125000e-02 : f32
    %85 = vector.broadcast %cst_35 : f32 to vector<8x1xf32>
    %86 = arith.mulf %82, %85 : vector<8x1xf32>
    %87 = arith.mulf %84, %84 : vector<8x1xf32>
    %88 = arith.subf %86, %87 : vector<8x1xf32>
    %89 = vector.broadcast %84 : vector<8x1xf32> to vector<8x128xf32>
    %90 = arith.subf %77, %89 : vector<8x128xf32>
    %cst_36 = arith.constant 9.99999974E-6 : f32
    %91 = vector.broadcast %cst_36 : f32 to vector<8x1xf32>
    %92 = arith.addf %88, %91 : vector<8x1xf32>
    %93 = math.rsqrt %92 : vector<8x1xf32>
    %94 = vector.broadcast %93 : vector<8x1xf32> to vector<8x128xf32>
    %95 = arith.mulf %90, %94 : vector<8x128xf32>
    %c0_37 = arith.constant 0 : index
    %c0_38 = arith.constant 0 : index
    %96 = vector.load %arg7[%c0_37, %c0_38] : memref<1x128xf32, #tpu.memory_space<vmem>>, vector<1x128xf32>
    %97 = vector.broadcast %96 : vector<1x128xf32> to vector<8x128xf32>
    %98 = arith.mulf %95, %97 : vector<8x128xf32>
    %c0_39 = arith.constant 0 : index
    %c0_40 = arith.constant 0 : index
    %99 = vector.load %arg8[%c0_39, %c0_40] : memref<1x128xf32, #tpu.memory_space<vmem>>, vector<1x128xf32>
    %100 = vector.broadcast %99 : vector<1x128xf32> to vector<8x128xf32>
    %101 = arith.addf %98, %100 : vector<8x128xf32>
    %102 = vector.shape_cast %101 : vector<8x128xf32> to vector<1x8x128xf32>
    %c0_41 = arith.constant 0 : index
    %c0_42 = arith.constant 0 : index
    %c0_43 = arith.constant 0 : index
    %103 = vector.load %arg9[%c0_41, %c0_42, %c0_43] : memref<1x8x128xf32, #tpu.memory_space<vmem>>, vector<1x8x128xf32>
    tpu.vector_store %arg9[%c0_41, %c0_42, %c0_43], %102 {strides = array<i32>} : memref<1x8x128xf32, #tpu.memory_space<vmem>>, vector<1x8x128xf32>,
    return
  }
  func.func @transform_0(%arg0: i32) -> (i32, i32, i32) {
    %c0_i32 = arith.constant 0 : i32
    %c0_i32_0 = arith.constant 0 : i32
    %c0_i32_1 = arith.constant 0 : i32
    return %arg0, %c0_i32, %c0_i32_0 : i32, i32, i32
  }
  func.func @transform_1(%arg0: i32) -> (i32, i32, i32) {
    %c0_i32 = arith.constant 0 : i32
    %c0_i32_0 = arith.constant 0 : i32
    %c0_i32_1 = arith.constant 0 : i32
    return %arg0, %c0_i32, %c0_i32_0 : i32, i32, i32
  }
  func.func @transform_2(%arg0: i32) -> (i32, i32) {
    %c0_i32 = arith.constant 0 : i32
    %c0_i32_0 = arith.constant 0 : i32
    %c0_i32_1 = arith.constant 0 : i32
    return %c0_i32, %c0_i32_0 : i32, i32
  }
  func.func @transform_3(%arg0: i32) -> (i32, i32) {
    %c0_i32 = arith.constant 0 : i32
    %c0_i32_0 = arith.constant 0 : i32
    %c0_i32_1 = arith.constant 0 : i32
    return %c0_i32, %c0_i32_0 : i32, i32
  }
  func.func @transform_4(%arg0: i32) -> (i32, i32) {
    %c0_i32 = arith.constant 0 : i32
    %c0_i32_0 = arith.constant 0 : i32
    %c0_i32_1 = arith.constant 0 : i32
    return %c0_i32, %c0_i32_0 : i32, i32
  }
  func.func @transform_5(%arg0: i32) -> (i32, i32) {
    %c0_i32 = arith.constant 0 : i32
    %c0_i32_0 = arith.constant 0 : i32
    %c0_i32_1 = arith.constant 0 : i32
    return %c0_i32, %c0_i32_0 : i32, i32
  }
  func.func @transform_6(%arg0: i32) -> (i32, i32) {
    %c0_i32 = arith.constant 0 : i32
    %c0_i32_0 = arith.constant 0 : i32
    %c0_i32_1 = arith.constant 0 : i32
    return %c0_i32, %c0_i32_0 : i32, i32
  }
  func.func @transform_7(%arg0: i32) -> (i32, i32) {
    %c0_i32 = arith.constant 0 : i32
    %c0_i32_0 = arith.constant 0 : i32
    %c0_i32_1 = arith.constant 0 : i32
    return %c0_i32, %c0_i32_0 : i32, i32
  }
  func.func @transform_8(%arg0: i32) -> (i32, i32, i32) {
    %c0_i32 = arith.constant 0 : i32
    %c0_i32_0 = arith.constant 0 : i32
    %c0_i32_1 = arith.constant 0 : i32
    return %arg0, %c0_i32, %c0_i32_0 : i32, i32, i32
  }
}

module attributes {stable_mosaic.version = 11 : i64} {
  func.func @cross_attn_kernel(%arg0: i32, %arg1: memref<1x8x128xf32, #tpu.memory_space<vmem>>, %arg2: memref<1x8x128xf32, #tpu.memory_space<vmem>>, %arg3: memref<128x32xf32, #tpu.memory_space<vmem>>, %arg4: memref<128x32xf32, #tpu.memory_space<vmem>>, %arg5: memref<128x32xf32, #tpu.memory_space<vmem>>, %arg6: memref<32x128xf32, #tpu.memory_space<vmem>>, %arg7: memref<1x128xf32, #tpu.memory_space<vmem>>, %arg8: memref<1x128xf32, #tpu.memory_space<vmem>>, %arg9: memref<1x8x128xf32, #tpu.memory_space<vmem>>) attributes {dimension_semantics = [#tpu.dimension_semantics<parallel>], iteration_bounds = array<i64: 2>, scalar_prefetch = 0 : i64, scratch_operands = 0 : i64, tpu.core_type = #tpu.core_type<tc>, window_params = [{transform_indices = @transform_0, window_bounds = array<i64: 1, 8, 128>}, {transform_indices = @transform_1, window_bounds = array<i64: 1, 8, 128>}, {pipeline_mode = #tpu.pipeline_mode<synchronous>, transform_indices = @transform_2, window_bounds = array<i64: 128, 32>}, {pipeline_mode = #tpu.pipeline_mode<synchronous>, transform_indices = @transform_3, window_bounds = array<i64: 128, 32>}, {pipeline_mode = #tpu.pipeline_mode<synchronous>, transform_indices = @transform_4, window_bounds = array<i64: 128, 32>}, {pipeline_mode = #tpu.pipeline_mode<synchronous>, transform_indices = @transform_5, window_bounds = array<i64: 32, 128>}, {pipeline_mode = #tpu.pipeline_mode<synchronous>, transform_indices = @transform_6, window_bounds = array<i64: 1, 128>}, {pipeline_mode = #tpu.pipeline_mode<synchronous>, transform_indices = @transform_7, window_bounds = array<i64: 1, 128>}, {transform_indices = @transform_8, window_bounds = array<i64: 1, 8, 128>}]} {
    %c0 = arith.constant 0 : index
    %c0_0 = arith.constant 0 : index
    %c0_1 = arith.constant 0 : index
    %0 = vector.load %arg1[%c0, %c0_0, %c0_1] : memref<1x8x128xf32, #tpu.memory_space<vmem>>, vector<1x8x128xf32>
    %1 = vector.shape_cast %0 : vector<1x8x128xf32> to vector<8x128xf32>
    %c0_2 = arith.constant 0 : index
    %c0_3 = arith.constant 0 : index
    %c0_4 = arith.constant 0 : index
    %2 = vector.load %arg2[%c0_2, %c0_3, %c0_4] : memref<1x8x128xf32, #tpu.memory_space<vmem>>, vector<1x8x128xf32>
    %3 = vector.shape_cast %2 : vector<1x8x128xf32> to vector<8x128xf32>
    %c0_5 = arith.constant 0 : index
    %c0_6 = arith.constant 0 : index
    %4 = vector.load %arg3[%c0_5, %c0_6] : memref<128x32xf32, #tpu.memory_space<vmem>>, vector<128x32xf32>
    %cst = arith.constant dense<0.000000e+00> : vector<8x32xf32>
    %5 = tpu.matmul %1, %4, %cst {dimension_numbers = #tpu.dot_dimension_numbers<[1], [0], [0], [1], [0, 0, 1, 1], [], []>} : vector<8x128xf32>, vector<128x32xf32>, vector<8x32xf32> -> vector<8x32xf32>
    %c0_7 = arith.constant 0 : index
    %c0_8 = arith.constant 0 : index
    %6 = vector.load %arg4[%c0_7, %c0_8] : memref<128x32xf32, #tpu.memory_space<vmem>>, vector<128x32xf32>
    %cst_9 = arith.constant dense<0.000000e+00> : vector<8x32xf32>
    %7 = tpu.matmul %3, %6, %cst_9 {dimension_numbers = #tpu.dot_dimension_numbers<[1], [0], [0], [1], [0, 0, 1, 1], [], []>} : vector<8x128xf32>, vector<128x32xf32>, vector<8x32xf32> -> vector<8x32xf32>
    %c0_10 = arith.constant 0 : index
    %c0_11 = arith.constant 0 : index
    %8 = vector.load %arg5[%c0_10, %c0_11] : memref<128x32xf32, #tpu.memory_space<vmem>>, vector<128x32xf32>
    %cst_12 = arith.constant dense<0.000000e+00> : vector<8x32xf32>
    %9 = tpu.matmul %3, %8, %cst_12 {dimension_numbers = #tpu.dot_dimension_numbers<[1], [0], [0], [1], [0, 0, 1, 1], [], []>} : vector<8x128xf32>, vector<128x32xf32>, vector<8x32xf32> -> vector<8x32xf32>
    %10 = vector.shape_cast %5 : vector<8x32xf32> to vector<1x8x32xf32>
    %11 = vector.shape_cast %7 : vector<8x32xf32> to vector<1x8x32xf32>
    %12 = vector.shape_cast %9 : vector<8x32xf32> to vector<1x8x32xf32>
    %13 = vector.extract_strided_slice %10 {offsets = [0, 0, 0], sizes = [1, 8, 8], strides = [1, 1, 1]} : vector<1x8x32xf32> to vector<1x8x8xf32>
    %14 = vector.extract_strided_slice %11 {offsets = [0, 0, 0], sizes = [1, 8, 8], strides = [1, 1, 1]} : vector<1x8x32xf32> to vector<1x8x8xf32>
    %15 = vector.extract_strided_slice %12 {offsets = [0, 0, 0], sizes = [1, 8, 8], strides = [1, 1, 1]} : vector<1x8x32xf32> to vector<1x8x8xf32>
    "tpu.trace_start"() <{level = 10 : i32, message = "bqd,bkd->bqk"}> : () -> ()
    %cst_13 = arith.constant dense<0.000000e+00> : vector<1x8x8xf32>
    %16 = tpu.matmul %13, %14, %cst_13 {dimension_numbers = #tpu.dot_dimension_numbers<[2], [2], [1], [1], [0, 0, 0, 1, 1, 1], [0], [0]>} : vector<1x8x8xf32>, vector<1x8x8xf32>, vector<1x8x8xf32> -> vector<1x8x8xf32>
    "tpu.trace_stop"() : () -> ()
    %cst_14 = arith.constant dense<0xFF800000> : vector<1x8xf32>
    %17 = vector.multi_reduction <maximumf>, %16, %cst_14 [2] : vector<1x8x8xf32> to vector<1x8xf32>
    %18 = vector.shape_cast %17 : vector<1x8xf32> to vector<1x8x1xf32>
    %19 = vector.broadcast %18 : vector<1x8x1xf32> to vector<1x8x8xf32>
    %20 = arith.subf %16, %19 : vector<1x8x8xf32>
    %21 = math.exp %20 : vector<1x8x8xf32>
    %cst_15 = arith.constant dense<0.000000e+00> : vector<1x8xf32>
    %22 = vector.multi_reduction <add>, %21, %cst_15 [2] : vector<1x8x8xf32> to vector<1x8xf32>
    %23 = vector.shape_cast %22 : vector<1x8xf32> to vector<1x8x1xf32>
    "tpu.trace_start"() <{level = 10 : i32, message = "bqk,bkd->bqd"}> : () -> ()
    %cst_16 = arith.constant dense<0.000000e+00> : vector<1x8x8xf32>
    %24 = tpu.matmul %21, %15, %cst_16 {dimension_numbers = #tpu.dot_dimension_numbers<[2], [1], [1], [2], [0, 0, 0, 1, 1, 2], [0], [0]>} : vector<1x8x8xf32>, vector<1x8x8xf32>, vector<1x8x8xf32> -> vector<1x8x8xf32>
    "tpu.trace_stop"() : () -> ()
    %25 = tpu.reciprocal %23 {approx = true} : vector<1x8x1xf32> -> vector<1x8x1xf32>
    %26 = vector.broadcast %25 : vector<1x8x1xf32> to vector<1x8x8xf32>
    %27 = arith.mulf %24, %26 : vector<1x8x8xf32>
    %28 = vector.extract_strided_slice %10 {offsets = [0, 0, 8], sizes = [1, 8, 8], strides = [1, 1, 1]} : vector<1x8x32xf32> to vector<1x8x8xf32>
    %29 = vector.extract_strided_slice %11 {offsets = [0, 0, 8], sizes = [1, 8, 8], strides = [1, 1, 1]} : vector<1x8x32xf32> to vector<1x8x8xf32>
    %30 = vector.extract_strided_slice %12 {offsets = [0, 0, 8], sizes = [1, 8, 8], strides = [1, 1, 1]} : vector<1x8x32xf32> to vector<1x8x8xf32>
    "tpu.trace_start"() <{level = 10 : i32, message = "bqd,bkd->bqk"}> : () -> ()
    %cst_17 = arith.constant dense<0.000000e+00> : vector<1x8x8xf32>
    %31 = tpu.matmul %28, %29, %cst_17 {dimension_numbers = #tpu.dot_dimension_numbers<[2], [2], [1], [1], [0, 0, 0, 1, 1, 1], [0], [0]>} : vector<1x8x8xf32>, vector<1x8x8xf32>, vector<1x8x8xf32> -> vector<1x8x8xf32>
    "tpu.trace_stop"() : () -> ()
    %cst_18 = arith.constant dense<0xFF800000> : vector<1x8xf32>
    %32 = vector.multi_reduction <maximumf>, %31, %cst_18 [2] : vector<1x8x8xf32> to vector<1x8xf32>
    %33 = vector.shape_cast %32 : vector<1x8xf32> to vector<1x8x1xf32>
    %34 = vector.broadcast %33 : vector<1x8x1xf32> to vector<1x8x8xf32>
    %35 = arith.subf %31, %34 : vector<1x8x8xf32>
    %36 = math.exp %35 : vector<1x8x8xf32>
    %cst_19 = arith.constant dense<0.000000e+00> : vector<1x8xf32>
    %37 = vector.multi_reduction <add>, %36, %cst_19 [2] : vector<1x8x8xf32> to vector<1x8xf32>
    %38 = vector.shape_cast %37 : vector<1x8xf32> to vector<1x8x1xf32>
    "tpu.trace_start"() <{level = 10 : i32, message = "bqk,bkd->bqd"}> : () -> ()
    %cst_20 = arith.constant dense<0.000000e+00> : vector<1x8x8xf32>
    %39 = tpu.matmul %36, %30, %cst_20 {dimension_numbers = #tpu.dot_dimension_numbers<[2], [1], [1], [2], [0, 0, 0, 1, 1, 2], [0], [0]>} : vector<1x8x8xf32>, vector<1x8x8xf32>, vector<1x8x8xf32> -> vector<1x8x8xf32>
    "tpu.trace_stop"() : () -> ()
    %40 = tpu.reciprocal %38 {approx = true} : vector<1x8x1xf32> -> vector<1x8x1xf32>
    %41 = vector.broadcast %40 : vector<1x8x1xf32> to vector<1x8x8xf32>
    %42 = arith.mulf %39, %41 : vector<1x8x8xf32>
    %43 = vector.extract_strided_slice %10 {offsets = [0, 0, 16], sizes = [1, 8, 8], strides = [1, 1, 1]} : vector<1x8x32xf32> to vector<1x8x8xf32>
    %44 = vector.extract_strided_slice %11 {offsets = [0, 0, 16], sizes = [1, 8, 8], strides = [1, 1, 1]} : vector<1x8x32xf32> to vector<1x8x8xf32>
    %45 = vector.extract_strided_slice %12 {offsets = [0, 0, 16], sizes = [1, 8, 8], strides = [1, 1, 1]} : vector<1x8x32xf32> to vector<1x8x8xf32>
    "tpu.trace_start"() <{level = 10 : i32, message = "bqd,bkd->bqk"}> : () -> ()
    %cst_21 = arith.constant dense<0.000000e+00> : vector<1x8x8xf32>
    %46 = tpu.matmul %43, %44, %cst_21 {dimension_numbers = #tpu.dot_dimension_numbers<[2], [2], [1], [1], [0, 0, 0, 1, 1, 1], [0], [0]>} : vector<1x8x8xf32>, vector<1x8x8xf32>, vector<1x8x8xf32> -> vector<1x8x8xf32>
    "tpu.trace_stop"() : () -> ()
    %cst_22 = arith.constant dense<0xFF800000> : vector<1x8xf32>
    %47 = vector.multi_reduction <maximumf>, %46, %cst_22 [2] : vector<1x8x8xf32> to vector<1x8xf32>
    %48 = vector.shape_cast %47 : vector<1x8xf32> to vector<1x8x1xf32>
    %49 = vector.broadcast %48 : vector<1x8x1xf32> to vector<1x8x8xf32>
    %50 = arith.subf %46, %49 : vector<1x8x8xf32>
    %51 = math.exp %50 : vector<1x8x8xf32>
    %cst_23 = arith.constant dense<0.000000e+00> : vector<1x8xf32>
    %52 = vector.multi_reduction <add>, %51, %cst_23 [2] : vector<1x8x8xf32> to vector<1x8xf32>
    %53 = vector.shape_cast %52 : vector<1x8xf32> to vector<1x8x1xf32>
    "tpu.trace_start"() <{level = 10 : i32, message = "bqk,bkd->bqd"}> : () -> ()
    %cst_24 = arith.constant dense<0.000000e+00> : vector<1x8x8xf32>
    %54 = tpu.matmul %51, %45, %cst_24 {dimension_numbers = #tpu.dot_dimension_numbers<[2], [1], [1], [2], [0, 0, 0, 1, 1, 2], [0], [0]>} : vector<1x8x8xf32>, vector<1x8x8xf32>, vector<1x8x8xf32> -> vector<1x8x8xf32>
    "tpu.trace_stop"() : () -> ()
    %55 = tpu.reciprocal %53 {approx = true} : vector<1x8x1xf32> -> vector<1x8x1xf32>
    %56 = vector.broadcast %55 : vector<1x8x1xf32> to vector<1x8x8xf32>
    %57 = arith.mulf %54, %56 : vector<1x8x8xf32>
    %58 = vector.extract_strided_slice %10 {offsets = [0, 0, 24], sizes = [1, 8, 8], strides = [1, 1, 1]} : vector<1x8x32xf32> to vector<1x8x8xf32>
    %59 = vector.extract_strided_slice %11 {offsets = [0, 0, 24], sizes = [1, 8, 8], strides = [1, 1, 1]} : vector<1x8x32xf32> to vector<1x8x8xf32>
    %60 = vector.extract_strided_slice %12 {offsets = [0, 0, 24], sizes = [1, 8, 8], strides = [1, 1, 1]} : vector<1x8x32xf32> to vector<1x8x8xf32>
    "tpu.trace_start"() <{level = 10 : i32, message = "bqd,bkd->bqk"}> : () -> ()
    %cst_25 = arith.constant dense<0.000000e+00> : vector<1x8x8xf32>
    %61 = tpu.matmul %58, %59, %cst_25 {dimension_numbers = #tpu.dot_dimension_numbers<[2], [2], [1], [1], [0, 0, 0, 1, 1, 1], [0], [0]>} : vector<1x8x8xf32>, vector<1x8x8xf32>, vector<1x8x8xf32> -> vector<1x8x8xf32>
    "tpu.trace_stop"() : () -> ()
    %cst_26 = arith.constant dense<0xFF800000> : vector<1x8xf32>
    %62 = vector.multi_reduction <maximumf>, %61, %cst_26 [2] : vector<1x8x8xf32> to vector<1x8xf32>
    %63 = vector.shape_cast %62 : vector<1x8xf32> to vector<1x8x1xf32>
    %64 = vector.broadcast %63 : vector<1x8x1xf32> to vector<1x8x8xf32>
    %65 = arith.subf %61, %64 : vector<1x8x8xf32>
    %66 = math.exp %65 : vector<1x8x8xf32>
    %cst_27 = arith.constant dense<0.000000e+00> : vector<1x8xf32>
    %67 = vector.multi_reduction <add>, %66, %cst_27 [2] : vector<1x8x8xf32> to vector<1x8xf32>
    %68 = vector.shape_cast %67 : vector<1x8xf32> to vector<1x8x1xf32>
    "tpu.trace_start"() <{level = 10 : i32, message = "bqk,bkd->bqd"}> : () -> ()
    %cst_28 = arith.constant dense<0.000000e+00> : vector<1x8x8xf32>
    %69 = tpu.matmul %66, %60, %cst_28 {dimension_numbers = #tpu.dot_dimension_numbers<[2], [1], [1], [2], [0, 0, 0, 1, 1, 2], [0], [0]>} : vector<1x8x8xf32>, vector<1x8x8xf32>, vector<1x8x8xf32> -> vector<1x8x8xf32>
    "tpu.trace_stop"() : () -> ()
    %70 = tpu.reciprocal %68 {approx = true} : vector<1x8x1xf32> -> vector<1x8x1xf32>
    %71 = vector.broadcast %70 : vector<1x8x1xf32> to vector<1x8x8xf32>
    %72 = arith.mulf %69, %71 : vector<1x8x8xf32>
    %73 = tpu.concatenate %27, %42, %57, %72 in 2 : vector<1x8x8xf32>, vector<1x8x8xf32>, vector<1x8x8xf32>, vector<1x8x8xf32> -> vector<1x8x32xf32>
    %74 = vector.shape_cast %73 : vector<1x8x32xf32> to vector<8x32xf32>
    %c0_29 = arith.constant 0 : index
    %c0_30 = arith.constant 0 : index
    %75 = vector.load %arg6[%c0_29, %c0_30] : memref<32x128xf32, #tpu.memory_space<vmem>>, vector<32x128xf32>
    %cst_31 = arith.constant dense<0.000000e+00> : vector<8x128xf32>
    %76 = tpu.matmul %74, %75, %cst_31 {dimension_numbers = #tpu.dot_dimension_numbers<[1], [0], [0], [1], [0, 0, 1, 1], [], []>} : vector<8x32xf32>, vector<32x128xf32>, vector<8x128xf32> -> vector<8x128xf32>
    %77 = arith.addf %76, %1 : vector<8x128xf32>
    %cst_32 = arith.constant dense<0.000000e+00> : vector<8xf32>
    %78 = vector.multi_reduction <add>, %77, %cst_32 [1] : vector<8x128xf32> to vector<8xf32>
    %79 = vector.shape_cast %78 : vector<8xf32> to vector<8x1xf32>
    %80 = arith.mulf %77, %77 : vector<8x128xf32>
    %cst_33 = arith.constant dense<0.000000e+00> : vector<8xf32>
    %81 = vector.multi_reduction <add>, %80, %cst_33 [1] : vector<8x128xf32> to vector<8xf32>
    %82 = vector.shape_cast %81 : vector<8xf32> to vector<8x1xf32>
    %cst_34 = arith.constant 3.125000e-02 : f32
    %83 = vector.broadcast %cst_34 : f32 to vector<8x1xf32>
    %84 = arith.mulf %79, %83 : vector<8x1xf32>
    %cst_35 = arith.constant 3.125000e-02 : f32
    %85 = vector.broadcast %cst_35 : f32 to vector<8x1xf32>
    %86 = arith.mulf %82, %85 : vector<8x1xf32>
    %87 = arith.mulf %84, %84 : vector<8x1xf32>
    %88 = arith.subf %86, %87 : vector<8x1xf32>
    %89 = vector.broadcast %84 : vector<8x1xf32> to vector<8x128xf32>
    %90 = arith.subf %77, %89 : vector<8x128xf32>
    %cst_36 = arith.constant 9.99999974E-6 : f32
    %91 = vector.broadcast %cst_36 : f32 to vector<8x1xf32>
    %92 = arith.addf %88, %91 : vector<8x1xf32>
    %93 = math.rsqrt %92 : vector<8x1xf32>
    %94 = vector.broadcast %93 : vector<8x1xf32> to vector<8x128xf32>
    %95 = arith.mulf %90, %94 : vector<8x128xf32>
    %c0_37 = arith.constant 0 : index
    %c0_38 = arith.constant 0 : index
    %96 = vector.load %arg7[%c0_37, %c0_38] : memref<1x128xf32, #tpu.memory_space<vmem>>, vector<1x128xf32>
    %97 = vector.broadcast %96 : vector<1x128xf32> to vector<8x128xf32>
    %98 = arith.mulf %95, %97 : vector<8x128xf32>
    %c0_39 = arith.constant 0 : index
    %c0_40 = arith.constant 0 : index
    %99 = vector.load %arg8[%c0_39, %c0_40] : memref<1x128xf32, #tpu.memory_space<vmem>>, vector<1x128xf32>
    %100 = vector.broadcast %99 : vector<1x128xf32> to vector<8x128xf32>
    %101 = arith.addf %98, %100 : vector<8x128xf32>
    %102 = vector.shape_cast %101 : vector<8x128xf32> to vector<1x8x128xf32>
    %c0_41 = arith.constant 0 : index
    %c0_42 = arith.constant 0 : index
    %c0_43 = arith.constant 0 : index
    %103 = vector.load %arg9[%c0_41, %c0_42, %c0_43] : memref<1x8x128xf32, #tpu.memory_space<vmem>>, vector<1x8x128xf32>
    tpu.vector_store %arg9[%c0_41, %c0_42, %c0_43], %102 {strides = array<i32>} : memref<1x8x128xf32, #tpu.memory_space<vmem>>, vector<1x8x128xf32>,
    return
  }
  func.func @transform_0(%arg0: i32) -> (i32, i32, i32) {
    %c0_i32 = arith.constant 0 : i32
    %c0_i32_0 = arith.constant 0 : i32
    %c0_i32_1 = arith.constant 0 : i32
    return %arg0, %c0_i32, %c0_i32_0 : i32, i32, i32
  }
  func.func @transform_1(%arg0: i32) -> (i32, i32, i32) {
    %c0_i32 = arith.constant 0 : i32
    %c0_i32_0 = arith.constant 0 : i32
    %c0_i32_1 = arith.constant 0 : i32
    return %arg0, %c0_i32, %c0_i32_0 : i32, i32, i32
  }
  func.func @transform_2(%arg0: i32) -> (i32, i32) {
    %c0_i32 = arith.constant 0 : i32
    %c0_i32_0 = arith.constant 0 : i32
    %c0_i32_1 = arith.constant 0 : i32
    return %c0_i32, %c0_i32_0 : i32, i32
  }
  func.func @transform_3(%arg0: i32) -> (i32, i32) {
    %c0_i32 = arith.constant 0 : i32
    %c0_i32_0 = arith.constant 0 : i32
    %c0_i32_1 = arith.constant 0 : i32
    return %c0_i32, %c0_i32_0 : i32, i32
  }
  func.func @transform_4(%arg0: i32) -> (i32, i32) {
    %c0_i32 = arith.constant 0 : i32
    %c0_i32_0 = arith.constant 0 : i32
    %c0_i32_1 = arith.constant 0 : i32
    return %c0_i32, %c0_i32_0 : i32, i32
  }
  func.func @transform_5(%arg0: i32) -> (i32, i32) {
    %c0_i32 = arith.constant 0 : i32
    %c0_i32_0 = arith.constant 0 : i32
    %c0_i32_1 = arith.constant 0 : i32
    return %c0_i32, %c0_i32_0 : i32, i32
  }
  func.func @transform_6(%arg0: i32) -> (i32, i32) {
    %c0_i32 = arith.constant 0 : i32
    %c0_i32_0 = arith.constant 0 : i32
    %c0_i32_1 = arith.constant 0 : i32
    return %c0_i32, %c0_i32_0 : i32, i32
  }
  func.func @transform_7(%arg0: i32) -> (i32, i32) {
    %c0_i32 = arith.constant 0 : i32
    %c0_i32_0 = arith.constant 0 : i32
    %c0_i32_1 = arith.constant 0 : i32
    return %c0_i32, %c0_i32_0 : i32, i32
  }
  func.func @transform_8(%arg0: i32) -> (i32, i32, i32) {
    %c0_i32 = arith.constant 0 : i32
    %c0_i32_0 = arith.constant 0 : i32
    %c0_i32_1 = arith.constant 0 : i32
    return %arg0, %c0_i32, %c0_i32_0 : i32, i32, i32
  }
}

</mosaic_0001>

<bundles_post_ra>
// kernel: tpu_custom_call.1
= control target key start
LH: loop header
LB: loop body
LE: loop exit
PB: predicated region body
PF: predicated region fallthrough
CT: control target
= control target key end

     0   :  { %13 = vsyncpa [#allocation3], 0  ;;  %s2317_s0 = inlined_call_operand.vmem [shape: f32[2,8,128], index: 0, kind: input, shape index: {}]   ;;  %s2318_s1 = inlined_call_operand.vmem [shape: f32[2,8,128], index: 1, kind: input, shape index: {}]   ;;  %s2319_s2 = inlined_call_operand.vmem [shape: f32[128,32], index: 2, kind: input, shape index: {}]   ;;  %s2320_s3 = inlined_call_operand.vmem [shape: f32[128,32], index: 3, kind: input, shape index: {}]   ;;  %s2321_s4 = inlined_call_operand.vmem [shape: f32[128,32], index: 4, kind: input, shape index: {}]   ;;  %s2322_s5 = inlined_call_operand.vmem [shape: f32[32,128], index: 5, kind: input, shape index: {}]   ;;  %s2323_s6 = inlined_call_operand.vmem [shape: f32[1,128], index: 6, kind: input, shape index: {}]   ;;  %s2324_s7 = inlined_call_operand.vmem [shape: f32[1,128], index: 7, kind: input, shape index: {}]   ;;  %s2325_s8 = inlined_call_operand.hbm [shape: f32[2,8,128], index: 8, kind: output, shape index: {}]  }
   0x1   :  { %15 = vsyncpa [#allocation3 + $0x1], 0  ;;  %s1962_s27 = smov 0   ;;  %s1964_s28 = smov 0  }
   0x2   :  { %s1966_s29 = smov 0   ;;  %s1968_s30 = smov 0  }
   0x3 LB: > { %s1983_s9 = sadd.s32 4294967295, %s1905_s30   ;;  %s1445_s10 = sadd.s32 4294967294, %s1905_s30   ;;  %s1905_s30 = sphi %s1968_s30, %s2331_s30   ;;  %s1901_s29 = sphi %s1966_s29, %s2330_s29   ;;  %s1897_s28 = sphi %s1964_s28, %s2329_s28   ;;  %s1893_s27 = sphi %s1962_s27, %s2328_s27  }
   0x4   : > { %s1987_s11 = sadd.s32 1, %s1905_s30   ;;  %s206_s12 = sadd.s32 1, %s1901_s29 }
   0x5   : > { %s203_s13 = ssub.s32 %s1905_s30, %s1987_s11  ;;  %p216_p0 = scmp.ne.s32.totalorder %s1901_s29, %s1897_s28 }
   0x6   : > { %p204_p1 = scmp.eq.s32.totalorder %s203_s13, 0  ;;  %p217_p2 = scmp.eq.s32.totalorder %s1983_s9, 1 }
   0x7   : > { %p222_p3 = scmp.ne.s32.totalorder %s1897_s28, %s1893_s27  ;;  %p223_p4 = scmp.eq.s32.totalorder %s1445_s10, 1 }
   0x8   : > { %s1998_s14 = scalar_select %p204_p1, %s1901_s29, %s206_s12  }
   0x9   : > { %p2000_p5 = por %p217_p2, %p216_p0  ;;  %p2004_p6 = por %p223_p4, %p222_p3 }
   0xa   : > { %p1448_p7 = scmp.ge.s32.totalorder %s1905_s30, 1  ;;  %p273_p8 = scmp.lt.s32.totalorder %s1905_s30, 3 }
   0xc   : > { %p274_p9 = pnand %p1448_p7, %p273_p8 }
   0xd   : > { %v406_v0 = vld [vmem:[%s2320_s3] sm:$0xff] (!%p274_p9)  ;;  %v407_v1 = vld [vmem:[%s2320_s3 + $0x8] sm:$0xff] (!%p274_p9)  ;;  %v1907_v3 = vmov (!%p274_p9), 0.0|0.0   ;;  %v408_v6 = vld [vmem:[%s2320_s3 + $0x10] sm:$0xff] (!%p274_p9)  ;;  %vm1908_vm0 = vmmov (!%p274_p9), 0   ;;  %v1909_v11 = vmov (!%p274_p9), 0.0  }
   0xe   : > { %277 = sbr.rel (%p274_p9) target bundleno = 2479 (0x9af), region = 52  ;;  %v320_v2 = vld [vmem:[%s2319_s2] sm:$0xff] (!%p274_p9)  ;;  %1723 = vmatprep.subr.bf16.mxu1 (!%p274_p9), %v1907_v3  ;;  %v1724_v4 = vpack.c.bf16 (!%p274_p9), %v407_v1, %v406_v0  ;;  %1699 = vmatprep.subr.bf16.mxu0 (!%p274_p9), %v1907_v3  ;;  %v321_v5 = vld [vmem:[%s2319_s2 + $0x8] sm:$0xff] (!%p274_p9)  ;;  %v409_v7 = vld [vmem:[%s2320_s3 + $0x18] sm:$0xff] (!%p274_p9)  ;;  %p310_p10 = scmp.lt.s32.totalorder (!%p274_p9), %s1983_s9, 1  ;;  %vm578_vm1 = vcmask (!%p274_p9), 64512  }
   0xf   : > { %v1700_v8 = vpack.c.bf16 (!%p274_p9), %v321_v5, %v320_v2  ;;  %v322_v9 = vld [vmem:[%s2319_s2 + $0x10] sm:$0xff] (!%p274_p9)  ;;  %v323_v10 = vld [vmem:[%s2319_s2 + $0x18] sm:$0xff] (!%p274_p9)  ;;  %1610 = vmatprep.mubr.msk.f32.mxu1 (!%p274_p9), %vm1908_vm0, %v1909_v11  ;;  %1575 = vmatprep.mubr.msk.f32.mxu0 (!%p274_p9), %vm1908_vm0, %v1909_v11  ;;  %v1727_v12 = vpack.c.bf16 (!%p274_p9), %v409_v7, %v408_v6  ;;  %v410_v14 = vld [vmem:[%s2320_s3 + $0x20] sm:$0xff] (!%p274_p9)  ;;  %s1911_s18 = smov (!%p274_p9), 112   ;;  %s1912_s19 = smov (!%p274_p9), 104   ;;  %vm1248_vm2 = vcmask (!%p274_p9), 130048  }
  0x10   : > { %1725 = vmatpush3.bf16.msra.mxu1 (!%p274_p9), %v1724_v4  ;;  %v1703_v13 = vpack.c.bf16 (!%p274_p9), %v323_v10, %v322_v9  ;;  %v411_v15 = vld [vmem:[%s2320_s3 + $0x28] sm:$0xff] (!%p274_p9)  ;;  %v324_v16 = vld [vmem:[%s2319_s2 + $0x20] sm:$0xff] (!%p274_p9)  ;;  %v412_v20 = vld [vmem:[%s2320_s3 + $0x30] sm:$0xff] (!%p274_p9)  ;;  %s1914_s22 = smov (!%p274_p9), 8   ;;  %vm1250_vm3 = vcmask (!%p274_p9), 195584   ;;  %vm1256_vm4 = vcmask (!%p274_p9), 261120  }
  0x11   : > { %1701 = vmatpush3.bf16.msra.mxu0 (!%p274_p9), %v1700_v8  ;;  %1726 = vmatprep.subr.bf16.mxu1 (!%p274_p9), %v1907_v3  ;;  %v325_v17 = vld [vmem:[%s2319_s2 + $0x28] sm:$0xff] (!%p274_p9)  ;;  %v1730_v18 = vpack.c.bf16 (!%p274_p9), %v411_v15, %v410_v14  ;;  %v413_v21 = vld [vmem:[%s2320_s3 + $0x38] sm:$0xff] (!%p274_p9)  ;;  %v326_v22 = vld [vmem:[%s2319_s2 + $0x30] sm:$0xff] (!%p274_p9) }
  0x12   : > { %1702 = vmatprep.subr.bf16.mxu0 (!%p274_p9), %v1907_v3  ;;  %v1706_v19 = vpack.c.bf16 (!%p274_p9), %v325_v17, %v324_v16  ;;  %v327_v23 = vld [vmem:[%s2319_s2 + $0x38] sm:$0xff] (!%p274_p9)  ;;  %v1733_v24 = vpack.c.bf16 (!%p274_p9), %v413_v21, %v412_v20  ;;  %v414_v26 = vld [vmem:[%s2320_s3 + $0x40] sm:$0xff] (!%p274_p9)  ;;  %v415_v27 = vld [vmem:[%s2320_s3 + $0x48] sm:$0xff] (!%p274_p9) }
  0x13   : > { %v1709_v25 = vpack.c.bf16 (!%p274_p9), %v327_v23, %v326_v22  ;;  %v328_v28 = vld [vmem:[%s2319_s2 + $0x40] sm:$0xff] (!%p274_p9)  ;;  %v329_v29 = vld [vmem:[%s2319_s2 + $0x48] sm:$0xff] (!%p274_p9)  ;;  %v1736_v30 = vpack.c.bf16 (!%p274_p9), %v415_v27, %v414_v26  ;;  %v416_v32 = vld [vmem:[%s2320_s3 + $0x50] sm:$0xff] (!%p274_p9) }
  0x14   : > { %1728 = vmatpush3.bf16.msra.mxu1 (!%p274_p9), %v1727_v12  ;;  %v1712_v31 = vpack.c.bf16 (!%p274_p9), %v329_v29, %v328_v28  ;;  %v417_v33 = vld [vmem:[%s2320_s3 + $0x58] sm:$0xff] (!%p274_p9)  ;;  %v330_v34 = vld [vmem:[%s2319_s2 + $0x50] sm:$0xff] (!%p274_p9)  ;;  %v418_v38 = vld [vmem:[%s2320_s3 + $0x60] sm:$0xff] (!%p274_p9) }
  0x15   : > { %1704 = vmatpush3.bf16.msra.mxu0 %v1703_v13  ;;  %1729 = vmatprep.subr.bf16.mxu1 %v1907_v3  ;;  %v331_v35 = vld [vmem:[%s2319_s2 + $0x58] sm:$0xff]  ;;  %v1739_v36 = vpack.c.bf16 %v417_v33, %v416_v32  ;;  %v419_v39 = vld [vmem:[%s2320_s3 + $0x68] sm:$0xff]  ;;  %v332_v40 = vld [vmem:[%s2319_s2 + $0x60] sm:$0xff]  ;;  %s311_s21 = scalar_select %p310_p10, %s1983_s9, 1 }
  0x16   : > { %1705 = vmatprep.subr.bf16.mxu0 %v1907_v3  ;;  %v1715_v37 = vpack.c.bf16 %v331_v35, %v330_v34  ;;  %v333_v41 = vld [vmem:[%s2319_s2 + $0x68] sm:$0xff]  ;;  %v1742_v42 = vpack.c.bf16 %v419_v39, %v418_v38  ;;  %v420_v44 = vld [vmem:[%s2320_s3 + $0x70] sm:$0xff]  ;;  %v421_v45 = vld [vmem:[%s2320_s3 + $0x78] sm:$0xff] }
  0x17   : > { %v1718_v43 = vpack.c.bf16 %v333_v41, %v332_v40  ;;  %v334_v46 = vld [vmem:[%s2319_s2 + $0x70] sm:$0xff]  ;;  %v335_v47 = vld [vmem:[%s2319_s2 + $0x78] sm:$0xff]  ;;  %s1450_s17 = sshll.u32 %s311_s21, 3  ;;  %v1745_v48 = vpack.c.bf16 %v421_v45, %v420_v44  ;;  %v492_v52 = vld [vmem:[%s2321_s4] sm:$0xff]  ;;  %s1468_s21 = sshll.u32 %s1983_s9, 7 }
  0x18   : > { %1731 = vmatpush3.bf16.msra.mxu1 %v1730_v18  ;;  %v1721_v49 = vpack.c.bf16 %v335_v47, %v334_v46  ;;  %s317_s20 = scalar_lea.vmem %s2318_s1, %s1450_s17  ;;  %s313_s24 = scalar_lea.vmem %s2317_s0, %s1450_s17  ;;  %v493_v53 = vld [vmem:[%s2321_s4 + $0x8] sm:$0xff]  ;;  %v494_v55 = vld [vmem:[%s2321_s4 + $0x10] sm:$0xff]  ;;  %v495_v56 = vld [vmem:[%s2321_s4 + $0x18] sm:$0xff] }
  0x19   : > { %1707 = vmatpush3.bf16.msra.mxu0 %v1706_v19  ;;  %1732 = vmatprep.subr.bf16.mxu1 %v1907_v3  ;;  %v319_v50 = vld [vmem:[%s317_s20] sm:$0xff]  ;;  %v1748_v54 = vpack.c.bf16 %v493_v53, %v492_v52  ;;  %v1751_v57 = vpack.c.bf16 %v495_v56, %v494_v55  ;;  %v497_v59 = vld [vmem:[%s2321_s4 + $0x28] sm:$0xff]  ;;  %v498_v61 = vld [vmem:[%s2321_s4 + $0x30] sm:$0xff]  ;;  %s1910_s17 = smov 120   ;;  %s1913_s20 = smov 16  }
  0x1a   : > { %1708 = vmatprep.subr.bf16.mxu0 %v1907_v3  ;;  %v2134_v51 = vld [vmem:[%s313_s24] sm:$0xff]  ;;  %v499_v62 = vld [vmem:[%s2321_s4 + $0x38] sm:$0xff]  ;;  %v501_v1 = vld [vmem:[%s2321_s4 + $0x48] sm:$0xff]  ;;  %s2275_s13 = scalar_lea.hbm %s2325_s8, %s1468_s21  ;;  %s1916_s9 = smov [#allocation2]  }
  0x1b   : > { %v496_v58 = vld [vmem:[%s2321_s4 + $0x20] sm:$0xff]  ;;  %v1757_v63 = vpack.c.bf16 %v499_v62, %v498_v61  ;;  %v502_v4 = vld [vmem:[%s2321_s4 + $0x50] sm:$0xff]  ;;  %v503_v5 = vld [vmem:[%s2321_s4 + $0x58] sm:$0xff] }
  0x1c   : > { %1734 = vmatpush3.bf16.msra.mxu1 %v1733_v24  ;;  %v1754_v60 = vpack.c.bf16 %v497_v59, %v496_v58  ;;  %v500_v0 = vld [vmem:[%s2321_s4 + $0x40] sm:$0xff]  ;;  %v1763_v6 = vpack.c.bf16 %v503_v5, %v502_v4  ;;  %v505_v8 = vld [vmem:[%s2321_s4 + $0x68] sm:$0xff]  ;;  %v506_v10 = vld [vmem:[%s2321_s4 + $0x70] sm:$0xff] }
  0x1d   : > { %1710 = vmatpush3.bf16.msra.mxu0 %v1709_v25  ;;  %1735 = vmatprep.subr.bf16.mxu1 %v1907_v3  ;;  %v1760_v2 = vpack.c.bf16 %v501_v1, %v500_v0  ;;  %v504_v7 = vld [vmem:[%s2321_s4 + $0x60] sm:$0xff]  ;;  %v507_v12 = vld [vmem:[%s2321_s4 + $0x78] sm:$0xff] }
  0x1e   : > { %1711 = vmatprep.subr.bf16.mxu0 %v1907_v3  ;;  %v1766_v9 = vpack.c.bf16 %v505_v8, %v504_v7  ;;  %v1769_v13 = vpack.c.bf16 %v507_v12, %v506_v10  ;;  %v1252_v10 = vld [vmem:[%s2322_s5] sm:$0xff]  ;;  %v1253_v12 = vld [vmem:[%s2322_s5 + $0x8] sm:$0xff] }
  0x20   : > { %1737 = vmatpush3.bf16.msra.mxu1 %v1736_v30 }
  0x21   : > { %1713 = vmatpush3.bf16.msra.mxu0 %v1712_v31  ;;  %1738 = vmatprep.subr.bf16.mxu1 %v1907_v3 }
  0x22   : > { %1714 = vmatprep.subr.bf16.mxu0 %v1907_v3 }
  0x24   : > { %1740 = vmatpush3.bf16.msra.mxu1 %v1739_v36 }
  0x25   : > { %1716 = vmatpush3.bf16.msra.mxu0 %v1715_v37  ;;  %1741 = vmatprep.subr.bf16.mxu1 %v1907_v3 }
  0x26   : > { %1717 = vmatprep.subr.bf16.mxu0 %v1907_v3 }
  0x28   : > { %1743 = vmatpush3.bf16.msra.mxu1 %v1742_v42 }
  0x29   : > { %1719 = vmatpush3.bf16.msra.mxu0 %v1718_v43  ;;  %1744 = vmatprep.subr.bf16.mxu1 %v1907_v3 }
  0x2a   : > { %1720 = vmatprep.subr.bf16.mxu0 %v1907_v3 }
  0x2c   : > { %1746 = vmatpush3.bf16.msra.mxu1 %v1745_v48 }
  0x2d   : > { %1722 = vmatpush3.bf16.msra.mxu0 %v1721_v49  ;;  %1648 = vmatprep.subr.mxu1 %v1909_v11 }
  0x2e   : > { %1747 = vmatprep.subr.bf16.mxu0 %v1907_v3 }
  0x2f   : > { %1611 = vmatmul.mubr.f32.vlgmr.msra.gmra.mrb[0].mxu1 %v319_v50 }
  0x30   : > { %1576 = vmatmul.mubr.f32.vlgmr.msra.gmra.mrb[0].mxu0 %v2134_v51  ;;  %1650 = vmatprep.mubr.msk.f32.mxu1 %vm1908_vm0, %v1909_v11 }
  0x31   : > { %1645 = vmatprep.mubr.msk.f32.mxu0 %vm1908_vm0, %v1909_v11  ;;  %1749 = vmatpush3.bf16.msra.mxu0 %v1748_v54 }
  0x32   : > { %1750 = vmatprep.subr.bf16.mxu0 %v1907_v3 }
  0x35   : > { %1752 = vmatpush3.bf16.msra.mxu0 %v1751_v57 }
  0x36   : > { %1753 = vmatprep.subr.bf16.mxu0 %v1907_v3 }
  0x39   : > { %1755 = vmatpush3.bf16.msra.mxu0 %v1754_v60 }
  0x3a   : > { %1756 = vmatprep.subr.bf16.mxu0 %v1907_v3 }
  0x3d   : > { %1758 = vmatpush3.bf16.msra.mxu0 %v1757_v63 }
  0x3e   : > { %1759 = vmatprep.subr.bf16.mxu0 %v1907_v3 }
  0x41   : > { %1761 = vmatpush3.bf16.msra.mxu0 %v1760_v2 }
  0x42   : > { %1762 = vmatprep.subr.bf16.mxu0 %v1907_v3 }
  0x45   : > { %1764 = vmatpush3.bf16.msra.mxu0 %v1763_v6 }
  0x46   : > { %1765 = vmatprep.subr.bf16.mxu0 %v1907_v3 }
  0x49   : > { %1767 = vmatpush3.bf16.msra.mxu0 %v1766_v9 }
  0x4a   : > { %1768 = vmatprep.subr.bf16.mxu0 %v1907_v3 }
  0x4d   : > { %1770 = vmatpush3.bf16.msra.mxu0 %v1769_v13  ;;  %v1254_v13 = vld [vmem:[%s2322_s5 + $0x10] sm:$0xff] }
  0x4e   : > { %1771 = vmatprep.subr.bf16.mxu0 %v1907_v3 }
  0x50   : > { %1646 = vmatmul.mubr.f32.vlgmr.msra.gmra.mrb[2].mxu0 %v319_v50 }
  0x51   : > { %1696 = vmatprep.mubr.msk.f32.mxu0 %vm1908_vm0, %v1909_v11 }
 0x102   : > { %v488_v14 = vpop.f32.mrb[0].mxu1 }
 0x103   : > { %v1612_v15 = vpop.f32.mrb[1].mxu1  ;;  %1649 = vmatpush3.xpose.msk.msra.mxu1 %vm578_vm1, %v488_v14  ;;  %v402_v16 = vpop.f32.mrb[0].mxu0 }
 0x104   : > { %v1577_v17 = vpop.f32.mrb[1].mxu0  ;;  %739 = vrot.lane.b32.xlu1 %v402_v16, %s1910_s17  ;;  %1653 = vmatprep.subr.mxu1 %v1909_v11  ;;  %v1255_v15 = vld [vmem:[%s2322_s5 + $0x18] sm:$0xff] }
 0x106   : > { %1651 = vmatmul.mubr.msk.f32.vlgmr.msra.gmra.mrb[2].mxu1 %vm578_vm1, %v402_v16 }
 0x107   : > { %1655 = vmatprep.mubr.msk.f32.mxu1 %vm1908_vm0, %v1909_v11 }
 0x123   : > { %v574_v18 = vpop.f32.mrb[2].mxu0 }
 0x124   : > { %v1647_v19 = vpop.f32.mrb[3].mxu0  ;;  %1654 = vmatpush3.msra.mxu1 %v574_v18 }
 0x125   : > { %1658 = vmatprep.subr.mxu1 %v1909_v11 }
 0x176   : > { %v740_v28 = vpop.permute.xlu1 %739 }
 0x1d9   : > { %v651_v20 = vpop.f32.mrb[2].mxu1 }
 0x1da   : > { %v1652_v21 = vpop.f32.mrb[3].mxu1  ;;  %v655_v22 = vsel %vm578_vm1, %v651_v20, -inf }
 0x1db   : > { %656 = vmax.xlane.f32.xlu0 %v655_v22 }
 0x1f1   : > { %741 = vrot.lane.b32.xlu0 %v488_v14, %s1910_s17 }
 0x1f5   : > { %827 = vrot.lane.b32.xlu0 %v574_v18, %s1910_s17  ;;  %s1915_s17 = smov 24  }
 0x1f9   : > { %907 = vrot.lane.b32.xlu0 %v488_v14, %s1911_s18 }
 0x1fd   : > { %905 = vrot.lane.b32.xlu0 %v402_v16, %s1911_s18 }
 0x268   : > { %v657_v23 = vpop.xlane.xlu0 %656 }
 0x269   : > { %v658_v24 = vsub.f32 %v651_v20, %v657_v23 }
 0x26b   : > { %v659_v25 = vmul.f32 1.442695, %v658_v24 }
 0x26c   : > { %v742_v26 = vpop.permute.xlu0 %741 }
 0x26d   : > { %1825 = vpow2.f32 %v659_v25 }
 0x270   : > { %v828_v29 = vpop.permute.xlu0 %827 }
 0x274   : > { %v908_v38 = vpop.permute.xlu0 %907 }
 0x277   : > { %v2208_v27 = vpop.eup %1825 }
 0x278   : > { %1656 = vmatmul.mubr.msk.f32.vlgmr.msra.gmra.mrb[4].mxu1 %vm578_vm1, %v2208_v27  ;;  %v906_v40 = vpop.permute.xlu0 %905  ;;  %v661_v7 = vsel %vm578_vm1, %v2208_v27, 0.0 }
 0x279   : > { %1659 = vmatpush3.xpose.msk.msra.mxu1 %vm578_vm1, %v742_v26  ;;  %1660 = vmatprep.mubr.msk.f32.mxu1 %vm1908_vm0, %v1909_v11 }
 0x27a   : > { %1663 = vmatprep.subr.mxu1 %v1909_v11 }
 0x27c   : > { %1661 = vmatmul.mubr.msk.f32.vlgmr.msra.gmra.mrb[6].mxu1 %vm578_vm1, %v740_v28 }
 0x27d   : > { %1664 = vmatpush3.msra.mxu1 %v828_v29  ;;  %1665 = vmatprep.mubr.msk.f32.mxu1 %vm1908_vm0, %v1909_v11 }
 0x27e   : > { %1668 = vmatprep.subr.mxu1 %v1909_v11 }
 0x34b   : > { %v2220_v30 = vpop.f32.mrb[4].mxu1 }
 0x34c   : > { %v1657_v31 = vpop.f32.mrb[5].mxu1 }
 0x34f   : > { %v813_v32 = vpop.f32.mrb[6].mxu1 }
 0x350   : > { %v1662_v33 = vpop.f32.mrb[7].mxu1  ;;  %v817_v34 = vsel %vm578_vm1, %v813_v32, -inf }
 0x351   : > { %818 = vmax.xlane.f32.xlu1 %v817_v34 }
 0x362   : > { %992 = vrot.lane.b32.xlu1 %v574_v18, %s1911_s18  ;;  %s307_s18 = sand.u32 1, %s1897_s28  }
 0x366   : > { %1072 = vrot.lane.b32.xlu1 %v488_v14, %s1912_s19  ;;  %v1772_v14 = vpack.c.bf16 %v1253_v12, %v1252_v10 }
 0x368   : > { %1773 = vmatpush3.bf16.msra.mxu0 %v1772_v14 }
 0x369   : > { %1774 = vmatprep.subr.bf16.mxu0 %v1907_v3 }
 0x36a   : > { %1070 = vrot.lane.b32.xlu1 %v402_v16, %s1912_s19  ;;  %v1775_v16 = vpack.c.bf16 %v1255_v15, %v1254_v13 }
 0x36c   : > { %1776 = vmatpush3.bf16.msra.mxu0 %v1775_v16 }
 0x3de   : > { %v819_v35 = vpop.xlane.xlu1 %818 }
 0x3df   : > { %v820_v36 = vsub.f32 %v813_v32, %v819_v35 }
 0x3e1   : > { %v821_v37 = vmul.f32 1.442695, %v820_v36 }
 0x3e2   : > { %v993_v41 = vpop.permute.xlu1 %992 }
 0x3e3   : > { %1827 = vpow2.f32 %v821_v37 }
 0x3e6   : > { %v1073_v52 = vpop.permute.xlu1 %1072 }
 0x3ea   : > { %v1071_v54 = vpop.permute.xlu1 %1070 }
 0x3ed   : > { %v1828_v39 = vpop.eup %1827 }
 0x3ee   : > { %1666 = vmatmul.mubr.msk.f32.vlgmr.msra.gmra.mrb[8].mxu1 %vm578_vm1, %v1828_v39  ;;  %v823_v47 = vsel %vm578_vm1, %v1828_v39, 0.0 }
 0x3ef   : > { %1669 = vmatpush3.xpose.msk.msra.mxu1 %vm578_vm1, %v908_v38  ;;  %1670 = vmatprep.mubr.msk.f32.mxu1 %vm1908_vm0, %v1909_v11 }
 0x3f0   : > { %1673 = vmatprep.subr.mxu1 %v1909_v11 }
 0x3f2   : > { %1671 = vmatmul.mubr.msk.f32.vlgmr.msra.gmra.mrb[10].mxu1 %vm578_vm1, %v906_v40 }
 0x3f3   : > { %1674 = vmatpush3.msra.mxu1 %v993_v41  ;;  %1675 = vmatprep.mubr.msk.f32.mxu1 %vm1908_vm0, %v1909_v11 }
 0x3f4   : > { %1678 = vmatprep.subr.mxu1 %v1909_v11 }
 0x4c1   : > { %v899_v42 = vpop.f32.mrb[8].mxu1 }
 0x4c2   : > { %v1667_v43 = vpop.f32.mrb[9].mxu1 }
 0x4c5   : > { %v979_v44 = vpop.f32.mrb[10].mxu1 }
 0x4c6   : > { %v1672_v45 = vpop.f32.mrb[11].mxu1  ;;  %v983_v46 = vsel %vm578_vm1, %v979_v44, -inf }
 0x4c7   : > { %984 = vmax.xlane.f32.xlu0 %v983_v46 }
 0x4dd   : > { %1157 = vrot.lane.b32.xlu0 %v574_v18, %s1912_s19  ;;  %s1449_s19 = sshll.u32 %s307_s18, 3 }
 0x4de   : > { %s309_s25 = scalar_lea.vmem [#allocation2], %s1449_s19  ;;  %s1847_s19 = sshll.u32 %s1916_s9, 4  ;;  %s1848_s19 = int_to_ptr.vmem [resolvable:$false] %s1847_s19 }
 0x4df   : > { %s1374_s26 = sshll.u32 %s309_s25, 4  ;;  %s2277_s26 = int_to_ptr.vmem [resolvable:$true] %s1374_s26 }
 0x4e0   : > { %p1850_p0 = scmp.lt.s32.totalorder %s2277_s26, %s1848_s19 }
 0x4fc   : > { %824 = vadd.xlane.f32.xlu0 %v823_v47 }
 0x554   : > { %v985_v48 = vpop.xlane.xlu0 %984 }
 0x555   : > { %v986_v49 = vsub.f32 %v979_v44, %v985_v48  ;;  %v1466_v44 = vld [vmem:[%s2324_s7] ss:$0 sm:$0xff] }
 0x557   : > { %v987_v50 = vmul.f32 1.442695, %v986_v49 }
 0x558   : > { %v1158_v55 = vpop.permute.xlu0 %1157 }
 0x559   : > { %1829 = vpow2.f32 %v987_v50 }
 0x563   : > { %v1830_v53 = vpop.eup %1829 }
 0x564   : > { %1676 = vmatmul.mubr.msk.f32.vlgmr.msra.gmra.mrb[12].mxu1 %vm578_vm1, %v1830_v53  ;;  %v989_v61 = vsel %vm578_vm1, %v1830_v53, 0.0 }
 0x565   : > { %1679 = vmatpush3.xpose.msk.msra.mxu1 %vm578_vm1, %v1073_v52  ;;  %1680 = vmatprep.mubr.msk.f32.mxu1 %vm1908_vm0, %v1909_v11 }
 0x566   : > { %1683 = vmatprep.subr.mxu1 %v1909_v11 }
 0x568   : > { %1681 = vmatmul.mubr.msk.f32.vlgmr.msra.gmra.mrb[14].mxu1 %vm578_vm1, %v1071_v54 }
 0x569   : > { %1684 = vmatpush3.msra.mxu1 %v1158_v55  ;;  %1685 = vmatprep.mubr.msk.f32.mxu1 %vm1908_vm0, %v1909_v11 }
 0x589   : > { %v825_v6 = vpop.xlane.xlu0 %824 }
 0x637   : > { %v1064_v56 = vpop.f32.mrb[12].mxu1 }
 0x638   : > { %v1677_v57 = vpop.f32.mrb[13].mxu1 }
 0x63b   : > { %v1144_v58 = vpop.f32.mrb[14].mxu1 }
 0x63c   : > { %v1682_v59 = vpop.f32.mrb[15].mxu1  ;;  %v1148_v60 = vsel %vm578_vm1, %v1144_v58, -inf }
 0x63d   : > { %1149 = vmax.xlane.f32.xlu1 %v1148_v60 }
 0x641   : > { %990 = vadd.xlane.f32.xlu1 %v989_v61 }
 0x6ca   : > { %v1150_v62 = vpop.xlane.xlu1 %1149 }
 0x6cb   : > { %v1151_v63 = vsub.f32 %v1144_v58, %v1150_v62 }
 0x6cd   : > { %v1152_v0 = vmul.f32 1.442695, %v1151_v63 }
 0x6ce   : > { %v991_v1 = vpop.xlane.xlu1 %990 }
 0x6cf   : > { %1831 = vpow2.f32 %v1152_v0 }
 0x6d0   : > { %1833 = vrcp.f32 %v991_v1 }
 0x6d1   : > { %1835 = vrcp.f32 %v825_v6 }
 0x6d9   : > { %v1832_v2 = vpop.eup %1831 }
 0x6da   : > { %v1834_v4 = vpop.eup %1833  ;;  %1686 = vmatmul.mubr.msk.f32.vlgmr.msra.gmra.mrb[16].mxu1 %vm578_vm1, %v1832_v2  ;;  %v1154_v11 = vsel %vm578_vm1, %v1832_v2, 0.0 }
 0x6db   : > { %1155 = vadd.xlane.f32.xlu1 %v1154_v11  ;;  %v1069_v5 = vmul.f32 %v1834_v4, %v1064_v56  ;;  %v1836_v8 = vpop.eup %1835 }
 0x6dc   : > { %v904_v9 = vmul.f32 %v1836_v8, %v899_v42 }
 0x6dd   : > { %1240 = vrot.lane.b32.xlu0 %v1069_v5, %s1913_s20  ;;  %s1843_s20 = scalar_lea.vmem %s2277_s26, 128 }
 0x6de   : > { %p1844_p11 = scmp.ne.s32.totalorder %s2277_s26, %s1843_s20 }
 0x6df   : > { %662 = vadd.xlane.f32.xlu1 %v661_v7 }
 0x6e0   : > { %p1845_p12 = pnand %p1844_p11, %p2000_p5 }
 0x6e2   : > { %p1846_p13 = pneg %p1845_p12 }
 0x6f0   : > { %1236 = vrot.lane.b32.xlu1 %v904_v9, %s1914_s22  ;;  %s1849_s22 = scalar_lea.vmem %s1848_s19, 256 }
 0x6f1   : > { %p1851_p1 = scmp.lt.s32.totalorder %s1849_s22, %s1843_s20 }
 0x6f3   : > { %p1852_p2 = por %p1851_p1, %p1850_p0 }
 0x6f5   : > { %p1853_p3 = pnand %p1852_p2, %p1846_p13 }
 0x74f   : > { %v1241_v3 = vpop.permute.xlu0 %1240 }
 0x768   : > { %v1156_v17 = vpop.xlane.xlu1 %1155 }
 0x769   : > { %1837 = vrcp.f32 %v1156_v17 }
 0x76c   : > { %v663_v22 = vpop.xlane.xlu1 %662 }
 0x76d   : > { %1839 = vrcp.f32 %v663_v22 }
 0x770   : > { %v1237_v25 = vpop.permute.xlu1 %1236 }
 0x773   : > { %v1838_v18 = vpop.eup %1837 }
 0x777   : > { %v1840_v23 = vpop.eup %1839 }
 0x778   : > { %v738_v24 = vmul.f32 %v1840_v23, %v2220_v30 }
 0x77a   : > { %v1247_v26 = vsel %vm578_vm1, %v738_v24, %v1237_v25 }
 0x77b   : > { %v1249_v27 = vsel %vm1248_vm2, %v1247_v26, %v1241_v3 }
 0x7ad   : > { %v1229_v19 = vpop.f32.mrb[16].mxu1 }
 0x7ae   : > { %v1234_v20 = vmul.f32 %v1838_v18, %v1229_v19  ;;  %v1687_v21 = vpop.f32.mrb[17].mxu1 }
 0x7b0   : > { %1244 = vrot.lane.b32.xlu1 %v1234_v20, %s1915_s17  ;;  %s1361_s17 = scalar_lea.sflag [#allocation3], %s307_s18 }
 0x822   : > { %v1245_v28 = vpop.permute.xlu1 %1244 }
 0x823   : > { %v1251_v29 = vsel %vm1250_vm3, %v1249_v27, %v1245_v28 }
 0x824   : > { %1697 = vmatmul.mubr.msk.f32.vlgmr.msra.gmra.mrb[4].mxu0 %vm1256_vm4, %v1251_v29 }
 0x8f7   : > { %v1326_v31 = vpop.f32.mrb[4].mxu0 }
 0x8f8   : > { %v1327_v32 = vadd.f32 %v1326_v31, %v2134_v51  ;;  %v1698_v33 = vpop.f32.mrb[5].mxu0  ;;  %v1465_v51 = vld [vmem:[%s2323_s6] ss:$0 sm:$0xff] }
 0x8fa   : > { %1330 = vadd.xlane.f32.xlu1 %v1327_v32  ;;  %v1332_v34 = vmul.f32 %v1327_v32, %v1327_v32 }
 0x8fc   : > { %1333 = vadd.xlane.f32.xlu0 %v1332_v34 }
 0x987   : > { %v1331_v30 = vpop.xlane.xlu1 %1330 }
 0x988   : > { %v1335_v35 = vmul.f32 0.03125, %v1331_v30 }
 0x989   : > { %v1334_v36 = vpop.xlane.xlu0 %1333 }
 0x98a   : > { %v1337_v37 = vmul.f32 %v1335_v35, %v1335_v35  ;;  %v1336_v38 = vmul.f32 0.03125, %v1334_v36  ;;  %v1339_v41 = vsub.f32 %v1327_v32, %v1335_v35 }
 0x98c   : > { %v1338_v39 = vsub.f32 %v1336_v38, %v1337_v37 }
 0x98e   : > { %v1340_v40 = vadd.f32 1e-05, %v1338_v39 }
 0x990   : > { %1841 = vrsqrt.f32 %v1340_v40 }
 0x99a   : > { %v1842_v42 = vpop.eup %1841 }
 0x99b   : > { %v1342_v43 = vmul.f32 %v1842_v42, %v1339_v41 }
 0x99d   : > { %v1350_v45 = vmul.f32 %v1465_v51, %v1342_v43 }
 0x99f   : > { %v1358_v46 = vadd.f32 %v1466_v44, %v1350_v45 }
 0x9a1   : > { %1359 = vst [vmem:[%s309_s25] sm:$0xff] %v1358_v46 }
 0x9a2   : > { %1856 = shalt.err (!%p1853_p3)
}
 0x9a3   : > { %s1857_s18 = scalar_lea.hbm %s2275_s13, 128  ;;  %s1861_s21 = scalar_lea.hbm %s2325_s8, 256 }
 0x9a4   : > { %p1858_p4 = scmp.ne.s32.totalorder %s2275_s13, %s1857_s18  ;;  %p1862_p9 = scmp.lt.u32.totalorder %s2275_s13, %s2325_s8 }
 0x9a5   : > { %p1863_p10 = scmp.lt.u32.totalorder %s1861_s21, %s1857_s18  ;;  %p1865_p12 = scmp.lt.u32.totalorder %s1857_s18, %s2275_s13 }
 0x9a6   : > { %p1859_p7 = pnand %p1858_p4, %p2000_p5 }
 0x9a7   : > { %p1864_p11 = por %p1863_p10, %p1862_p9 }
 0x9a8   : > { %p1860_p8 = pneg %p1859_p7 }
 0x9a9   : > { %p1866_p13 = por %p1865_p12, %p1864_p11 }
 0x9ab   : > { %p1867_p0 = pnand %p1866_p13, %p1860_p8 }
 0x9ad   : > { %1870 = shalt.err (!%p1867_p0)
}
 0x9ae   : > { %1777 = dma.vmem_to_hbm [thread:$0]  (%p2000_p5), %s2277_s26, 128, %s2275_s13, %s1361_s17  }
 0x9af PF: > { %p1783_p1 = scmp.ge.s32.totalorder %s1905_s30, 2  ;;  %s1386_s12 = sand.u32 1, %s1893_s27  }
 0x9b0   : > { %s1387_s20 = scalar_lea.sflag [#allocation3], %s1386_s12 }
 0x9b1   : > { %p1780_p2 = pnand %p1783_p1, %p2004_p6 }
 0x9b3   : > { %1888 = dma.done.wait (!%p1780_p2), %s1387_s20, 128  }
 0x9b4   : > { %1890 = vsyncadd (!%p1780_p2), %s1387_s20, 4294967168  ;;  %p18_p3 = scmp.ge.s32.totalorder %s1987_s11, 4   ;;  %s2328_s27 = smov %s1897_s28 }
 0x9b5   : > { %s2329_s28 = smov %s1901_s29  ;;  %s2330_s29 = smov %s1998_s14 }
 0x9b6   : > { %s2331_s30 = smov %s1987_s11  ;;  %20 = sbr.rel (!%p18_p3) target bundleno = 3 (0x3), region = 90 }
 0x9bd   :  { %1392 = vsyncpa [#allocation3], 1 }
 0x9be   :  { %1394 = vsyncpa [#allocation3 + $0x1], 1 }

// kernel: tpu_custom_call.1
= control target key start
LH: loop header
LB: loop body
LE: loop exit
PB: predicated region body
PF: predicated region fallthrough
CT: control target
= control target key end

     0   :  { %13 = vsyncpa [#allocation3], 0  ;;  %s2317_s0 = inlined_call_operand.vmem [shape: f32[2,8,128], index: 0, kind: input, shape index: {}]   ;;  %s2318_s1 = inlined_call_operand.vmem [shape: f32[2,8,128], index: 1, kind: input, shape index: {}]   ;;  %s2319_s2 = inlined_call_operand.vmem [shape: f32[128,32], index: 2, kind: input, shape index: {}]   ;;  %s2320_s3 = inlined_call_operand.vmem [shape: f32[128,32], index: 3, kind: input, shape index: {}]   ;;  %s2321_s4 = inlined_call_operand.vmem [shape: f32[128,32], index: 4, kind: input, shape index: {}]   ;;  %s2322_s5 = inlined_call_operand.vmem [shape: f32[32,128], index: 5, kind: input, shape index: {}]   ;;  %s2323_s6 = inlined_call_operand.vmem [shape: f32[1,128], index: 6, kind: input, shape index: {}]   ;;  %s2324_s7 = inlined_call_operand.vmem [shape: f32[1,128], index: 7, kind: input, shape index: {}]   ;;  %s2325_s8 = inlined_call_operand.hbm [shape: f32[2,8,128], index: 8, kind: output, shape index: {}]  }
   0x1   :  { %15 = vsyncpa [#allocation3 + $0x1], 0  ;;  %s1962_s27 = smov 0   ;;  %s1964_s28 = smov 0  }
   0x2   :  { %s1966_s29 = smov 0   ;;  %s1968_s30 = smov 0  }
   0x3 LB: > { %s1983_s9 = sadd.s32 4294967295, %s1905_s30   ;;  %s1445_s10 = sadd.s32 4294967294, %s1905_s30   ;;  %s1905_s30 = sphi %s1968_s30, %s2331_s30   ;;  %s1901_s29 = sphi %s1966_s29, %s2330_s29   ;;  %s1897_s28 = sphi %s1964_s28, %s2329_s28   ;;  %s1893_s27 = sphi %s1962_s27, %s2328_s27  }
   0x4   : > { %s1987_s11 = sadd.s32 1, %s1905_s30   ;;  %s206_s12 = sadd.s32 1, %s1901_s29 }
   0x5   : > { %s203_s13 = ssub.s32 %s1905_s30, %s1987_s11  ;;  %p216_p0 = scmp.ne.s32.totalorder %s1901_s29, %s1897_s28 }
   0x6   : > { %p204_p1 = scmp.eq.s32.totalorder %s203_s13, 0  ;;  %p217_p2 = scmp.eq.s32.totalorder %s1983_s9, 1 }
   0x7   : > { %p222_p3 = scmp.ne.s32.totalorder %s1897_s28, %s1893_s27  ;;  %p223_p4 = scmp.eq.s32.totalorder %s1445_s10, 1 }
   0x8   : > { %s1998_s14 = scalar_select %p204_p1, %s1901_s29, %s206_s12  }
   0x9   : > { %p2000_p5 = por %p217_p2, %p216_p0  ;;  %p2004_p6 = por %p223_p4, %p222_p3 }
   0xa   : > { %p1448_p7 = scmp.ge.s32.totalorder %s1905_s30, 1  ;;  %p273_p8 = scmp.lt.s32.totalorder %s1905_s30, 3 }
   0xc   : > { %p274_p9 = pnand %p1448_p7, %p273_p8 }
   0xd   : > { %v406_v0 = vld [vmem:[%s2320_s3] sm:$0xff] (!%p274_p9)  ;;  %v407_v1 = vld [vmem:[%s2320_s3 + $0x8] sm:$0xff] (!%p274_p9)  ;;  %v1907_v3 = vmov (!%p274_p9), 0.0|0.0   ;;  %v408_v6 = vld [vmem:[%s2320_s3 + $0x10] sm:$0xff] (!%p274_p9)  ;;  %vm1908_vm0 = vmmov (!%p274_p9), 0   ;;  %v1909_v11 = vmov (!%p274_p9), 0.0  }
   0xe   : > { %277 = sbr.rel (%p274_p9) target bundleno = 2479 (0x9af), region = 52  ;;  %v320_v2 = vld [vmem:[%s2319_s2] sm:$0xff] (!%p274_p9)  ;;  %1723 = vmatprep.subr.bf16.mxu1 (!%p274_p9), %v1907_v3  ;;  %v1724_v4 = vpack.c.bf16 (!%p274_p9), %v407_v1, %v406_v0  ;;  %1699 = vmatprep.subr.bf16.mxu0 (!%p274_p9), %v1907_v3  ;;  %v321_v5 = vld [vmem:[%s2319_s2 + $0x8] sm:$0xff] (!%p274_p9)  ;;  %v409_v7 = vld [vmem:[%s2320_s3 + $0x18] sm:$0xff] (!%p274_p9)  ;;  %p310_p10 = scmp.lt.s32.totalorder (!%p274_p9), %s1983_s9, 1  ;;  %vm578_vm1 = vcmask (!%p274_p9), 64512  }
   0xf   : > { %v1700_v8 = vpack.c.bf16 (!%p274_p9), %v321_v5, %v320_v2  ;;  %v322_v9 = vld [vmem:[%s2319_s2 + $0x10] sm:$0xff] (!%p274_p9)  ;;  %v323_v10 = vld [vmem:[%s2319_s2 + $0x18] sm:$0xff] (!%p274_p9)  ;;  %1610 = vmatprep.mubr.msk.f32.mxu1 (!%p274_p9), %vm1908_vm0, %v1909_v11  ;;  %1575 = vmatprep.mubr.msk.f32.mxu0 (!%p274_p9), %vm1908_vm0, %v1909_v11  ;;  %v1727_v12 = vpack.c.bf16 (!%p274_p9), %v409_v7, %v408_v6  ;;  %v410_v14 = vld [vmem:[%s2320_s3 + $0x20] sm:$0xff] (!%p274_p9)  ;;  %s1911_s18 = smov (!%p274_p9), 112   ;;  %s1912_s19 = smov (!%p274_p9), 104   ;;  %vm1248_vm2 = vcmask (!%p274_p9), 130048  }
  0x10   : > { %1725 = vmatpush3.bf16.msra.mxu1 (!%p274_p9), %v1724_v4  ;;  %v1703_v13 = vpack.c.bf16 (!%p274_p9), %v323_v10, %v322_v9  ;;  %v411_v15 = vld [vmem:[%s2320_s3 + $0x28] sm:$0xff] (!%p274_p9)  ;;  %v324_v16 = vld [vmem:[%s2319_s2 + $0x20] sm:$0xff] (!%p274_p9)  ;;  %v412_v20 = vld [vmem:[%s2320_s3 + $0x30] sm:$0xff] (!%p274_p9)  ;;  %s1914_s22 = smov (!%p274_p9), 8   ;;  %vm1250_vm3 = vcmask (!%p274_p9), 195584   ;;  %vm1256_vm4 = vcmask (!%p274_p9), 261120  }
  0x11   : > { %1701 = vmatpush3.bf16.msra.mxu0 (!%p274_p9), %v1700_v8  ;;  %1726 = vmatprep.subr.bf16.mxu1 (!%p274_p9), %v1907_v3  ;;  %v325_v17 = vld [vmem:[%s2319_s2 + $0x28] sm:$0xff] (!%p274_p9)  ;;  %v1730_v18 = vpack.c.bf16 (!%p274_p9), %v411_v15, %v410_v14  ;;  %v413_v21 = vld [vmem:[%s2320_s3 + $0x38] sm:$0xff] (!%p274_p9)  ;;  %v326_v22 = vld [vmem:[%s2319_s2 + $0x30] sm:$0xff] (!%p274_p9) }
  0x12   : > { %1702 = vmatprep.subr.bf16.mxu0 (!%p274_p9), %v1907_v3  ;;  %v1706_v19 = vpack.c.bf16 (!%p274_p9), %v325_v17, %v324_v16  ;;  %v327_v23 = vld [vmem:[%s2319_s2 + $0x38] sm:$0xff] (!%p274_p9)  ;;  %v1733_v24 = vpack.c.bf16 (!%p274_p9), %v413_v21, %v412_v20  ;;  %v414_v26 = vld [vmem:[%s2320_s3 + $0x40] sm:$0xff] (!%p274_p9)  ;;  %v415_v27 = vld [vmem:[%s2320_s3 + $0x48] sm:$0xff] (!%p274_p9) }
  0x13   : > { %v1709_v25 = vpack.c.bf16 (!%p274_p9), %v327_v23, %v326_v22  ;;  %v328_v28 = vld [vmem:[%s2319_s2 + $0x40] sm:$0xff] (!%p274_p9)  ;;  %v329_v29 = vld [vmem:[%s2319_s2 + $0x48] sm:$0xff] (!%p274_p9)  ;;  %v1736_v30 = vpack.c.bf16 (!%p274_p9), %v415_v27, %v414_v26  ;;  %v416_v32 = vld [vmem:[%s2320_s3 + $0x50] sm:$0xff] (!%p274_p9) }
  0x14   : > { %1728 = vmatpush3.bf16.msra.mxu1 (!%p274_p9), %v1727_v12  ;;  %v1712_v31 = vpack.c.bf16 (!%p274_p9), %v329_v29, %v328_v28  ;;  %v417_v33 = vld [vmem:[%s2320_s3 + $0x58] sm:$0xff] (!%p274_p9)  ;;  %v330_v34 = vld [vmem:[%s2319_s2 + $0x50] sm:$0xff] (!%p274_p9)  ;;  %v418_v38 = vld [vmem:[%s2320_s3 + $0x60] sm:$0xff] (!%p274_p9) }
  0x15   : > { %1704 = vmatpush3.bf16.msra.mxu0 %v1703_v13  ;;  %1729 = vmatprep.subr.bf16.mxu1 %v1907_v3  ;;  %v331_v35 = vld [vmem:[%s2319_s2 + $0x58] sm:$0xff]  ;;  %v1739_v36 = vpack.c.bf16 %v417_v33, %v416_v32  ;;  %v419_v39 = vld [vmem:[%s2320_s3 + $0x68] sm:$0xff]  ;;  %v332_v40 = vld [vmem:[%s2319_s2 + $0x60] sm:$0xff]  ;;  %s311_s21 = scalar_select %p310_p10, %s1983_s9, 1 }
  0x16   : > { %1705 = vmatprep.subr.bf16.mxu0 %v1907_v3  ;;  %v1715_v37 = vpack.c.bf16 %v331_v35, %v330_v34  ;;  %v333_v41 = vld [vmem:[%s2319_s2 + $0x68] sm:$0xff]  ;;  %v1742_v42 = vpack.c.bf16 %v419_v39, %v418_v38  ;;  %v420_v44 = vld [vmem:[%s2320_s3 + $0x70] sm:$0xff]  ;;  %v421_v45 = vld [vmem:[%s2320_s3 + $0x78] sm:$0xff] }
  0x17   : > { %v1718_v43 = vpack.c.bf16 %v333_v41, %v332_v40  ;;  %v334_v46 = vld [vmem:[%s2319_s2 + $0x70] sm:$0xff]  ;;  %v335_v47 = vld [vmem:[%s2319_s2 + $0x78] sm:$0xff]  ;;  %s1450_s17 = sshll.u32 %s311_s21, 3  ;;  %v1745_v48 = vpack.c.bf16 %v421_v45, %v420_v44  ;;  %v492_v52 = vld [vmem:[%s2321_s4] sm:$0xff]  ;;  %s1468_s21 = sshll.u32 %s1983_s9, 7 }
  0x18   : > { %1731 = vmatpush3.bf16.msra.mxu1 %v1730_v18  ;;  %v1721_v49 = vpack.c.bf16 %v335_v47, %v334_v46  ;;  %s317_s20 = scalar_lea.vmem %s2318_s1, %s1450_s17  ;;  %s313_s24 = scalar_lea.vmem %s2317_s0, %s1450_s17  ;;  %v493_v53 = vld [vmem:[%s2321_s4 + $0x8] sm:$0xff]  ;;  %v494_v55 = vld [vmem:[%s2321_s4 + $0x10] sm:$0xff]  ;;  %v495_v56 = vld [vmem:[%s2321_s4 + $0x18] sm:$0xff] }
  0x19   : > { %1707 = vmatpush3.bf16.msra.mxu0 %v1706_v19  ;;  %1732 = vmatprep.subr.bf16.mxu1 %v1907_v3  ;;  %v319_v50 = vld [vmem:[%s317_s20] sm:$0xff]  ;;  %v1748_v54 = vpack.c.bf16 %v493_v53, %v492_v52  ;;  %v1751_v57 = vpack.c.bf16 %v495_v56, %v494_v55  ;;  %v497_v59 = vld [vmem:[%s2321_s4 + $0x28] sm:$0xff]  ;;  %v498_v61 = vld [vmem:[%s2321_s4 + $0x30] sm:$0xff]  ;;  %s1910_s17 = smov 120   ;;  %s1913_s20 = smov 16  }
  0x1a   : > { %1708 = vmatprep.subr.bf16.mxu0 %v1907_v3  ;;  %v2134_v51 = vld [vmem:[%s313_s24] sm:$0xff]  ;;  %v499_v62 = vld [vmem:[%s2321_s4 + $0x38] sm:$0xff]  ;;  %v501_v1 = vld [vmem:[%s2321_s4 + $0x48] sm:$0xff]  ;;  %s2275_s13 = scalar_lea.hbm %s2325_s8, %s1468_s21  ;;  %s1916_s9 = smov [#allocation2]  }
  0x1b   : > { %v496_v58 = vld [vmem:[%s2321_s4 + $0x20] sm:$0xff]  ;;  %v1757_v63 = vpack.c.bf16 %v499_v62, %v498_v61  ;;  %v502_v4 = vld [vmem:[%s2321_s4 + $0x50] sm:$0xff]  ;;  %v503_v5 = vld [vmem:[%s2321_s4 + $0x58] sm:$0xff] }
  0x1c   : > { %1734 = vmatpush3.bf16.msra.mxu1 %v1733_v24  ;;  %v1754_v60 = vpack.c.bf16 %v497_v59, %v496_v58  ;;  %v500_v0 = vld [vmem:[%s2321_s4 + $0x40] sm:$0xff]  ;;  %v1763_v6 = vpack.c.bf16 %v503_v5, %v502_v4  ;;  %v505_v8 = vld [vmem:[%s2321_s4 + $0x68] sm:$0xff]  ;;  %v506_v10 = vld [vmem:[%s2321_s4 + $0x70] sm:$0xff] }
  0x1d   : > { %1710 = vmatpush3.bf16.msra.mxu0 %v1709_v25  ;;  %1735 = vmatprep.subr.bf16.mxu1 %v1907_v3  ;;  %v1760_v2 = vpack.c.bf16 %v501_v1, %v500_v0  ;;  %v504_v7 = vld [vmem:[%s2321_s4 + $0x60] sm:$0xff]  ;;  %v507_v12 = vld [vmem:[%s2321_s4 + $0x78] sm:$0xff] }
  0x1e   : > { %1711 = vmatprep.subr.bf16.mxu0 %v1907_v3  ;;  %v1766_v9 = vpack.c.bf16 %v505_v8, %v504_v7  ;;  %v1769_v13 = vpack.c.bf16 %v507_v12, %v506_v10  ;;  %v1252_v10 = vld [vmem:[%s2322_s5] sm:$0xff]  ;;  %v1253_v12 = vld [vmem:[%s2322_s5 + $0x8] sm:$0xff] }
  0x20   : > { %1737 = vmatpush3.bf16.msra.mxu1 %v1736_v30 }
  0x21   : > { %1713 = vmatpush3.bf16.msra.mxu0 %v1712_v31  ;;  %1738 = vmatprep.subr.bf16.mxu1 %v1907_v3 }
  0x22   : > { %1714 = vmatprep.subr.bf16.mxu0 %v1907_v3 }
  0x24   : > { %1740 = vmatpush3.bf16.msra.mxu1 %v1739_v36 }
  0x25   : > { %1716 = vmatpush3.bf16.msra.mxu0 %v1715_v37  ;;  %1741 = vmatprep.subr.bf16.mxu1 %v1907_v3 }
  0x26   : > { %1717 = vmatprep.subr.bf16.mxu0 %v1907_v3 }
  0x28   : > { %1743 = vmatpush3.bf16.msra.mxu1 %v1742_v42 }
  0x29   : > { %1719 = vmatpush3.bf16.msra.mxu0 %v1718_v43  ;;  %1744 = vmatprep.subr.bf16.mxu1 %v1907_v3 }
  0x2a   : > { %1720 = vmatprep.subr.bf16.mxu0 %v1907_v3 }
  0x2c   : > { %1746 = vmatpush3.bf16.msra.mxu1 %v1745_v48 }
  0x2d   : > { %1722 = vmatpush3.bf16.msra.mxu0 %v1721_v49  ;;  %1648 = vmatprep.subr.mxu1 %v1909_v11 }
  0x2e   : > { %1747 = vmatprep.subr.bf16.mxu0 %v1907_v3 }
  0x2f   : > { %1611 = vmatmul.mubr.f32.vlgmr.msra.gmra.mrb[0].mxu1 %v319_v50 }
  0x30   : > { %1576 = vmatmul.mubr.f32.vlgmr.msra.gmra.mrb[0].mxu0 %v2134_v51  ;;  %1650 = vmatprep.mubr.msk.f32.mxu1 %vm1908_vm0, %v1909_v11 }
  0x31   : > { %1645 = vmatprep.mubr.msk.f32.mxu0 %vm1908_vm0, %v1909_v11  ;;  %1749 = vmatpush3.bf16.msra.mxu0 %v1748_v54 }
  0x32   : > { %1750 = vmatprep.subr.bf16.mxu0 %v1907_v3 }
  0x35   : > { %1752 = vmatpush3.bf16.msra.mxu0 %v1751_v57 }
  0x36   : > { %1753 = vmatprep.subr.bf16.mxu0 %v1907_v3 }
  0x39   : > { %1755 = vmatpush3.bf16.msra.mxu0 %v1754_v60 }
  0x3a   : > { %1756 = vmatprep.subr.bf16.mxu0 %v1907_v3 }
  0x3d   : > { %1758 = vmatpush3.bf16.msra.mxu0 %v1757_v63 }
  0x3e   : > { %1759 = vmatprep.subr.bf16.mxu0 %v1907_v3 }
  0x41   : > { %1761 = vmatpush3.bf16.msra.mxu0 %v1760_v2 }
  0x42   : > { %1762 = vmatprep.subr.bf16.mxu0 %v1907_v3 }
  0x45   : > { %1764 = vmatpush3.bf16.msra.mxu0 %v1763_v6 }
  0x46   : > { %1765 = vmatprep.subr.bf16.mxu0 %v1907_v3 }
  0x49   : > { %1767 = vmatpush3.bf16.msra.mxu0 %v1766_v9 }
  0x4a   : > { %1768 = vmatprep.subr.bf16.mxu0 %v1907_v3 }
  0x4d   : > { %1770 = vmatpush3.bf16.msra.mxu0 %v1769_v13  ;;  %v1254_v13 = vld [vmem:[%s2322_s5 + $0x10] sm:$0xff] }
  0x4e   : > { %1771 = vmatprep.subr.bf16.mxu0 %v1907_v3 }
  0x50   : > { %1646 = vmatmul.mubr.f32.vlgmr.msra.gmra.mrb[2].mxu0 %v319_v50 }
  0x51   : > { %1696 = vmatprep.mubr.msk.f32.mxu0 %vm1908_vm0, %v1909_v11 }
 0x102   : > { %v488_v14 = vpop.f32.mrb[0].mxu1 }
 0x103   : > { %v1612_v15 = vpop.f32.mrb[1].mxu1  ;;  %1649 = vmatpush3.xpose.msk.msra.mxu1 %vm578_vm1, %v488_v14  ;;  %v402_v16 = vpop.f32.mrb[0].mxu0 }
 0x104   : > { %v1577_v17 = vpop.f32.mrb[1].mxu0  ;;  %739 = vrot.lane.b32.xlu1 %v402_v16, %s1910_s17  ;;  %1653 = vmatprep.subr.mxu1 %v1909_v11  ;;  %v1255_v15 = vld [vmem:[%s2322_s5 + $0x18] sm:$0xff] }
 0x106   : > { %1651 = vmatmul.mubr.msk.f32.vlgmr.msra.gmra.mrb[2].mxu1 %vm578_vm1, %v402_v16 }
 0x107   : > { %1655 = vmatprep.mubr.msk.f32.mxu1 %vm1908_vm0, %v1909_v11 }
 0x123   : > { %v574_v18 = vpop.f32.mrb[2].mxu0 }
 0x124   : > { %v1647_v19 = vpop.f32.mrb[3].mxu0  ;;  %1654 = vmatpush3.msra.mxu1 %v574_v18 }
 0x125   : > { %1658 = vmatprep.subr.mxu1 %v1909_v11 }
 0x176   : > { %v740_v28 = vpop.permute.xlu1 %739 }
 0x1d9   : > { %v651_v20 = vpop.f32.mrb[2].mxu1 }
 0x1da   : > { %v1652_v21 = vpop.f32.mrb[3].mxu1  ;;  %v655_v22 = vsel %vm578_vm1, %v651_v20, -inf }
 0x1db   : > { %656 = vmax.xlane.f32.xlu0 %v655_v22 }
 0x1f1   : > { %741 = vrot.lane.b32.xlu0 %v488_v14, %s1910_s17 }
 0x1f5   : > { %827 = vrot.lane.b32.xlu0 %v574_v18, %s1910_s17  ;;  %s1915_s17 = smov 24  }
 0x1f9   : > { %907 = vrot.lane.b32.xlu0 %v488_v14, %s1911_s18 }
 0x1fd   : > { %905 = vrot.lane.b32.xlu0 %v402_v16, %s1911_s18 }
 0x268   : > { %v657_v23 = vpop.xlane.xlu0 %656 }
 0x269   : > { %v658_v24 = vsub.f32 %v651_v20, %v657_v23 }
 0x26b   : > { %v659_v25 = vmul.f32 1.442695, %v658_v24 }
 0x26c   : > { %v742_v26 = vpop.permute.xlu0 %741 }
 0x26d   : > { %1825 = vpow2.f32 %v659_v25 }
 0x270   : > { %v828_v29 = vpop.permute.xlu0 %827 }
 0x274   : > { %v908_v38 = vpop.permute.xlu0 %907 }
 0x277   : > { %v2208_v27 = vpop.eup %1825 }
 0x278   : > { %1656 = vmatmul.mubr.msk.f32.vlgmr.msra.gmra.mrb[4].mxu1 %vm578_vm1, %v2208_v27  ;;  %v906_v40 = vpop.permute.xlu0 %905  ;;  %v661_v7 = vsel %vm578_vm1, %v2208_v27, 0.0 }
 0x279   : > { %1659 = vmatpush3.xpose.msk.msra.mxu1 %vm578_vm1, %v742_v26  ;;  %1660 = vmatprep.mubr.msk.f32.mxu1 %vm1908_vm0, %v1909_v11 }
 0x27a   : > { %1663 = vmatprep.subr.mxu1 %v1909_v11 }
 0x27c   : > { %1661 = vmatmul.mubr.msk.f32.vlgmr.msra.gmra.mrb[6].mxu1 %vm578_vm1, %v740_v28 }
 0x27d   : > { %1664 = vmatpush3.msra.mxu1 %v828_v29  ;;  %1665 = vmatprep.mubr.msk.f32.mxu1 %vm1908_vm0, %v1909_v11 }
 0x27e   : > { %1668 = vmatprep.subr.mxu1 %v1909_v11 }
 0x34b   : > { %v2220_v30 = vpop.f32.mrb[4].mxu1 }
 0x34c   : > { %v1657_v31 = vpop.f32.mrb[5].mxu1 }
 0x34f   : > { %v813_v32 = vpop.f32.mrb[6].mxu1 }
 0x350   : > { %v1662_v33 = vpop.f32.mrb[7].mxu1  ;;  %v817_v34 = vsel %vm578_vm1, %v813_v32, -inf }
 0x351   : > { %818 = vmax.xlane.f32.xlu1 %v817_v34 }
 0x362   : > { %992 = vrot.lane.b32.xlu1 %v574_v18, %s1911_s18  ;;  %s307_s18 = sand.u32 1, %s1897_s28  }
 0x366   : > { %1072 = vrot.lane.b32.xlu1 %v488_v14, %s1912_s19  ;;  %v1772_v14 = vpack.c.bf16 %v1253_v12, %v1252_v10 }
 0x368   : > { %1773 = vmatpush3.bf16.msra.mxu0 %v1772_v14 }
 0x369   : > { %1774 = vmatprep.subr.bf16.mxu0 %v1907_v3 }
 0x36a   : > { %1070 = vrot.lane.b32.xlu1 %v402_v16, %s1912_s19  ;;  %v1775_v16 = vpack.c.bf16 %v1255_v15, %v1254_v13 }
 0x36c   : > { %1776 = vmatpush3.bf16.msra.mxu0 %v1775_v16 }
 0x3de   : > { %v819_v35 = vpop.xlane.xlu1 %818 }
 0x3df   : > { %v820_v36 = vsub.f32 %v813_v32, %v819_v35 }
 0x3e1   : > { %v821_v37 = vmul.f32 1.442695, %v820_v36 }
 0x3e2   : > { %v993_v41 = vpop.permute.xlu1 %992 }
 0x3e3   : > { %1827 = vpow2.f32 %v821_v37 }
 0x3e6   : > { %v1073_v52 = vpop.permute.xlu1 %1072 }
 0x3ea   : > { %v1071_v54 = vpop.permute.xlu1 %1070 }
 0x3ed   : > { %v1828_v39 = vpop.eup %1827 }
 0x3ee   : > { %1666 = vmatmul.mubr.msk.f32.vlgmr.msra.gmra.mrb[8].mxu1 %vm578_vm1, %v1828_v39  ;;  %v823_v47 = vsel %vm578_vm1, %v1828_v39, 0.0 }
 0x3ef   : > { %1669 = vmatpush3.xpose.msk.msra.mxu1 %vm578_vm1, %v908_v38  ;;  %1670 = vmatprep.mubr.msk.f32.mxu1 %vm1908_vm0, %v1909_v11 }
 0x3f0   : > { %1673 = vmatprep.subr.mxu1 %v1909_v11 }
 0x3f2   : > { %1671 = vmatmul.mubr.msk.f32.vlgmr.msra.gmra.mrb[10].mxu1 %vm578_vm1, %v906_v40 }
 0x3f3   : > { %1674 = vmatpush3.msra.mxu1 %v993_v41  ;;  %1675 = vmatprep.mubr.msk.f32.mxu1 %vm1908_vm0, %v1909_v11 }
 0x3f4   : > { %1678 = vmatprep.subr.mxu1 %v1909_v11 }
 0x4c1   : > { %v899_v42 = vpop.f32.mrb[8].mxu1 }
 0x4c2   : > { %v1667_v43 = vpop.f32.mrb[9].mxu1 }
 0x4c5   : > { %v979_v44 = vpop.f32.mrb[10].mxu1 }
 0x4c6   : > { %v1672_v45 = vpop.f32.mrb[11].mxu1  ;;  %v983_v46 = vsel %vm578_vm1, %v979_v44, -inf }
 0x4c7   : > { %984 = vmax.xlane.f32.xlu0 %v983_v46 }
 0x4dd   : > { %1157 = vrot.lane.b32.xlu0 %v574_v18, %s1912_s19  ;;  %s1449_s19 = sshll.u32 %s307_s18, 3 }
 0x4de   : > { %s309_s25 = scalar_lea.vmem [#allocation2], %s1449_s19  ;;  %s1847_s19 = sshll.u32 %s1916_s9, 4  ;;  %s1848_s19 = int_to_ptr.vmem [resolvable:$false] %s1847_s19 }
 0x4df   : > { %s1374_s26 = sshll.u32 %s309_s25, 4  ;;  %s2277_s26 = int_to_ptr.vmem [resolvable:$true] %s1374_s26 }
 0x4e0   : > { %p1850_p0 = scmp.lt.s32.totalorder %s2277_s26, %s1848_s19 }
 0x4fc   : > { %824 = vadd.xlane.f32.xlu0 %v823_v47 }
 0x554   : > { %v985_v48 = vpop.xlane.xlu0 %984 }
 0x555   : > { %v986_v49 = vsub.f32 %v979_v44, %v985_v48  ;;  %v1466_v44 = vld [vmem:[%s2324_s7] ss:$0 sm:$0xff] }
 0x557   : > { %v987_v50 = vmul.f32 1.442695, %v986_v49 }
 0x558   : > { %v1158_v55 = vpop.permute.xlu0 %1157 }
 0x559   : > { %1829 = vpow2.f32 %v987_v50 }
 0x563   : > { %v1830_v53 = vpop.eup %1829 }
 0x564   : > { %1676 = vmatmul.mubr.msk.f32.vlgmr.msra.gmra.mrb[12].mxu1 %vm578_vm1, %v1830_v53  ;;  %v989_v61 = vsel %vm578_vm1, %v1830_v53, 0.0 }
 0x565   : > { %1679 = vmatpush3.xpose.msk.msra.mxu1 %vm578_vm1, %v1073_v52  ;;  %1680 = vmatprep.mubr.msk.f32.mxu1 %vm1908_vm0, %v1909_v11 }
 0x566   : > { %1683 = vmatprep.subr.mxu1 %v1909_v11 }
 0x568   : > { %1681 = vmatmul.mubr.msk.f32.vlgmr.msra.gmra.mrb[14].mxu1 %vm578_vm1, %v1071_v54 }
 0x569   : > { %1684 = vmatpush3.msra.mxu1 %v1158_v55  ;;  %1685 = vmatprep.mubr.msk.f32.mxu1 %vm1908_vm0, %v1909_v11 }
 0x589   : > { %v825_v6 = vpop.xlane.xlu0 %824 }
 0x637   : > { %v1064_v56 = vpop.f32.mrb[12].mxu1 }
 0x638   : > { %v1677_v57 = vpop.f32.mrb[13].mxu1 }
 0x63b   : > { %v1144_v58 = vpop.f32.mrb[14].mxu1 }
 0x63c   : > { %v1682_v59 = vpop.f32.mrb[15].mxu1  ;;  %v1148_v60 = vsel %vm578_vm1, %v1144_v58, -inf }
 0x63d   : > { %1149 = vmax.xlane.f32.xlu1 %v1148_v60 }
 0x641   : > { %990 = vadd.xlane.f32.xlu1 %v989_v61 }
 0x6ca   : > { %v1150_v62 = vpop.xlane.xlu1 %1149 }
 0x6cb   : > { %v1151_v63 = vsub.f32 %v1144_v58, %v1150_v62 }
 0x6cd   : > { %v1152_v0 = vmul.f32 1.442695, %v1151_v63 }
 0x6ce   : > { %v991_v1 = vpop.xlane.xlu1 %990 }
 0x6cf   : > { %1831 = vpow2.f32 %v1152_v0 }
 0x6d0   : > { %1833 = vrcp.f32 %v991_v1 }
 0x6d1   : > { %1835 = vrcp.f32 %v825_v6 }
 0x6d9   : > { %v1832_v2 = vpop.eup %1831 }
 0x6da   : > { %v1834_v4 = vpop.eup %1833  ;;  %1686 = vmatmul.mubr.msk.f32.vlgmr.msra.gmra.mrb[16].mxu1 %vm578_vm1, %v1832_v2  ;;  %v1154_v11 = vsel %vm578_vm1, %v1832_v2, 0.0 }
 0x6db   : > { %1155 = vadd.xlane.f32.xlu1 %v1154_v11  ;;  %v1069_v5 = vmul.f32 %v1834_v4, %v1064_v56  ;;  %v1836_v8 = vpop.eup %1835 }
 0x6dc   : > { %v904_v9 = vmul.f32 %v1836_v8, %v899_v42 }
 0x6dd   : > { %1240 = vrot.lane.b32.xlu0 %v1069_v5, %s1913_s20  ;;  %s1843_s20 = scalar_lea.vmem %s2277_s26, 128 }
 0x6de   : > { %p1844_p11 = scmp.ne.s32.totalorder %s2277_s26, %s1843_s20 }
 0x6df   : > { %662 = vadd.xlane.f32.xlu1 %v661_v7 }
 0x6e0   : > { %p1845_p12 = pnand %p1844_p11, %p2000_p5 }
 0x6e2   : > { %p1846_p13 = pneg %p1845_p12 }
 0x6f0   : > { %1236 = vrot.lane.b32.xlu1 %v904_v9, %s1914_s22  ;;  %s1849_s22 = scalar_lea.vmem %s1848_s19, 256 }
 0x6f1   : > { %p1851_p1 = scmp.lt.s32.totalorder %s1849_s22, %s1843_s20 }
 0x6f3   : > { %p1852_p2 = por %p1851_p1, %p1850_p0 }
 0x6f5   : > { %p1853_p3 = pnand %p1852_p2, %p1846_p13 }
 0x74f   : > { %v1241_v3 = vpop.permute.xlu0 %1240 }
 0x768   : > { %v1156_v17 = vpop.xlane.xlu1 %1155 }
 0x769   : > { %1837 = vrcp.f32 %v1156_v17 }
 0x76c   : > { %v663_v22 = vpop.xlane.xlu1 %662 }
 0x76d   : > { %1839 = vrcp.f32 %v663_v22 }
 0x770   : > { %v1237_v25 = vpop.permute.xlu1 %1236 }
 0x773   : > { %v1838_v18 = vpop.eup %1837 }
 0x777   : > { %v1840_v23 = vpop.eup %1839 }
 0x778   : > { %v738_v24 = vmul.f32 %v1840_v23, %v2220_v30 }
 0x77a   : > { %v1247_v26 = vsel %vm578_vm1, %v738_v24, %v1237_v25 }
 0x77b   : > { %v1249_v27 = vsel %vm1248_vm2, %v1247_v26, %v1241_v3 }
 0x7ad   : > { %v1229_v19 = vpop.f32.mrb[16].mxu1 }
 0x7ae   : > { %v1234_v20 = vmul.f32 %v1838_v18, %v1229_v19  ;;  %v1687_v21 = vpop.f32.mrb[17].mxu1 }
 0x7b0   : > { %1244 = vrot.lane.b32.xlu1 %v1234_v20, %s1915_s17  ;;  %s1361_s17 = scalar_lea.sflag [#allocation3], %s307_s18 }
 0x822   : > { %v1245_v28 = vpop.permute.xlu1 %1244 }
 0x823   : > { %v1251_v29 = vsel %vm1250_vm3, %v1249_v27, %v1245_v28 }
 0x824   : > { %1697 = vmatmul.mubr.msk.f32.vlgmr.msra.gmra.mrb[4].mxu0 %vm1256_vm4, %v1251_v29 }
 0x8f7   : > { %v1326_v31 = vpop.f32.mrb[4].mxu0 }
 0x8f8   : > { %v1327_v32 = vadd.f32 %v1326_v31, %v2134_v51  ;;  %v1698_v33 = vpop.f32.mrb[5].mxu0  ;;  %v1465_v51 = vld [vmem:[%s2323_s6] ss:$0 sm:$0xff] }
 0x8fa   : > { %1330 = vadd.xlane.f32.xlu1 %v1327_v32  ;;  %v1332_v34 = vmul.f32 %v1327_v32, %v1327_v32 }
 0x8fc   : > { %1333 = vadd.xlane.f32.xlu0 %v1332_v34 }
 0x987   : > { %v1331_v30 = vpop.xlane.xlu1 %1330 }
 0x988   : > { %v1335_v35 = vmul.f32 0.03125, %v1331_v30 }
 0x989   : > { %v1334_v36 = vpop.xlane.xlu0 %1333 }
 0x98a   : > { %v1337_v37 = vmul.f32 %v1335_v35, %v1335_v35  ;;  %v1336_v38 = vmul.f32 0.03125, %v1334_v36  ;;  %v1339_v41 = vsub.f32 %v1327_v32, %v1335_v35 }
 0x98c   : > { %v1338_v39 = vsub.f32 %v1336_v38, %v1337_v37 }
 0x98e   : > { %v1340_v40 = vadd.f32 1e-05, %v1338_v39 }
 0x990   : > { %1841 = vrsqrt.f32 %v1340_v40 }
 0x99a   : > { %v1842_v42 = vpop.eup %1841 }
 0x99b   : > { %v1342_v43 = vmul.f32 %v1842_v42, %v1339_v41 }
 0x99d   : > { %v1350_v45 = vmul.f32 %v1465_v51, %v1342_v43 }
 0x99f   : > { %v1358_v46 = vadd.f32 %v1466_v44, %v1350_v45 }
 0x9a1   : > { %1359 = vst [vmem:[%s309_s25] sm:$0xff] %v1358_v46 }
 0x9a2   : > { %1856 = shalt.err (!%p1853_p3)
}
 0x9a3   : > { %s1857_s18 = scalar_lea.hbm %s2275_s13, 128  ;;  %s1861_s21 = scalar_lea.hbm %s2325_s8, 256 }
 0x9a4   : > { %p1858_p4 = scmp.ne.s32.totalorder %s2275_s13, %s1857_s18  ;;  %p1862_p9 = scmp.lt.u32.totalorder %s2275_s13, %s2325_s8 }
 0x9a5   : > { %p1863_p10 = scmp.lt.u32.totalorder %s1861_s21, %s1857_s18  ;;  %p1865_p12 = scmp.lt.u32.totalorder %s1857_s18, %s2275_s13 }
 0x9a6   : > { %p1859_p7 = pnand %p1858_p4, %p2000_p5 }
 0x9a7   : > { %p1864_p11 = por %p1863_p10, %p1862_p9 }
 0x9a8   : > { %p1860_p8 = pneg %p1859_p7 }
 0x9a9   : > { %p1866_p13 = por %p1865_p12, %p1864_p11 }
 0x9ab   : > { %p1867_p0 = pnand %p1866_p13, %p1860_p8 }
 0x9ad   : > { %1870 = shalt.err (!%p1867_p0)
}
 0x9ae   : > { %1777 = dma.vmem_to_hbm [thread:$0]  (%p2000_p5), %s2277_s26, 128, %s2275_s13, %s1361_s17  }
 0x9af PF: > { %p1783_p1 = scmp.ge.s32.totalorder %s1905_s30, 2  ;;  %s1386_s12 = sand.u32 1, %s1893_s27  }
 0x9b0   : > { %s1387_s20 = scalar_lea.sflag [#allocation3], %s1386_s12 }
 0x9b1   : > { %p1780_p2 = pnand %p1783_p1, %p2004_p6 }
 0x9b3   : > { %1888 = dma.done.wait (!%p1780_p2), %s1387_s20, 128  }
 0x9b4   : > { %1890 = vsyncadd (!%p1780_p2), %s1387_s20, 4294967168  ;;  %p18_p3 = scmp.ge.s32.totalorder %s1987_s11, 4   ;;  %s2328_s27 = smov %s1897_s28 }
 0x9b5   : > { %s2329_s28 = smov %s1901_s29  ;;  %s2330_s29 = smov %s1998_s14 }
 0x9b6   : > { %s2331_s30 = smov %s1987_s11  ;;  %20 = sbr.rel (!%p18_p3) target bundleno = 3 (0x3), region = 90 }
 0x9bd   :  { %1392 = vsyncpa [#allocation3], 1 }
 0x9be   :  { %1394 = vsyncpa [#allocation3 + $0x1], 1 }

</bundles_post_ra>
